<compile_context>
chip_gen: v7x
topology: tpu7x:2x2x1
jax: 0.10.0
libtpu: 0.0.40
codegen_flags: <defaults>
</compile_context>

<pallas_src>
import functools

import jax
import jax.numpy as jnp
from jax.experimental import pallas as pl
from jax.experimental.pallas import tpu as pltpu


def _round_up(x, m):
    return (x + m - 1) // m * m


def _cdiv(a, b):
    return -(-a // b)


def _choose_batch_tile(batch, dp, target_rows=256):
    """TB*Dp is the row count streamed per diffusion matmul (target ~256 to
    amortize the MXU weight load), but keep >=2 grid steps when the batch
    allows it so both v7x TensorCores get work."""
    tb = max(1, min(_cdiv(target_rows, dp), batch))
    if _cdiv(batch, tb) < 2 and batch > 1:
        half = _cdiv(batch, 2)
        if half * dp >= 128:
            tb = half
    return tb


def _graphconv_kernel(sup_ref, x_ref, w_ref, b_ref, o_ref, slab_ref, *,
                      n_supports, max_step, tb, dp):
    # sup_ref : (S, Np, Np)    transposed supports A^T, grid-invariant
    # x_ref   : (TB*Dp, Np)    Y0 = X0^T for this batch tile (rows = (t, d))
    # w_ref   : (Oq, M*Dp)     fused Linear weight, columns reordered to (m, d)
    # b_ref   : (Oq, 1)        bias column
    # o_ref   : (Oq, TB*Np)    output block, lanes = (t, n) -> dense stores
    # slab_ref: (M*Dp, TB*Np)  f32 scratch holding every diffusion metric
    np_l = x_ref.shape[-1]

    def stash(metric, y):
        # Write metric `metric` of batch element t to rows [metric*Dp, +Dp) and
        # lanes [t*Np, +Np): dense, statically 8/128-aligned tile copies
        # (no concatenate / relayout; only x1 / x_prev stay live).
        for t in range(tb):
            slab_ref[metric * dp:(metric + 1) * dp,
                     t * np_l:(t + 1) * np_l] = y[t * dp:(t + 1) * dp, :]

    y0 = x_ref[...].astype(jnp.float32)
    stash(0, y0)
    if max_step > 0:
        y_prev = y0                      # carried across supports (matches torch)
        m = 1
        for s in range(n_supports):      # small static unroll
            a_t = sup_ref[s]             # (Np, Np) == support^T
            # Y_k = Y_{k-1} @ A^T  <=>  X_k = A @ X_{k-1}; lanes = Np (128-mult)
            y1 = jnp.dot(y_prev, a_t, preferred_element_type=jnp.float32)
            stash(m, y1)
            m += 1
            for _k in range(2, max_step + 1):
                y2 = 2.0 * jnp.dot(y1, a_t,
                                   preferred_element_type=jnp.float32) - y_prev
                stash(m, y2)
                m += 1
                y1, y_prev = y2, y1

    # Fused projection: one big-K matmul covering every metric and every batch
    # element of the tile at once: (Oq, M*Dp) @ (M*Dp, TB*Np).
    proj = jnp.dot(w_ref[...], slab_ref[...], preferred_element_type=jnp.float32)
    o_ref[...] = (proj + b_ref[...]).astype(o_ref.dtype)


def batch_graphconv(inputs, supports, weight, bias, *, max_step):
    """inputs: [B, N, D]; supports: [S, N, N] dense (shared across the batch,
    as in the torch module); weight: [O, D*M] (nn.Linear layout); bias: [O].
    Returns [B, N, O]."""
    n_supports, N, _ = supports.shape
    B, _, D = inputs.shape
    M = max_step * n_supports + 1
    O = bias.shape[0]
    assert weight.shape == (O, D * M)

    Np = _round_up(N, 128)     # lane dim everywhere + diffusion contraction depth
    Dp = _round_up(D, 8)       # per-metric sublane slot
    Oq = _round_up(O, 8)
    TB = _choose_batch_tile(B, Dp)
    Bp = _round_up(B, TB)
    n_tiles = Bp // TB

    # ---- one-time wrapper-side layout plumbing (amortized over the grid) ----
    sup_t = jnp.transpose(
        jnp.pad(supports, ((0, 0), (0, Np - N), (0, Np - N))), (0, 2, 1))
    x = jnp.transpose(inputs, (0, 2, 1))                     # [B, D, N]
    x = jnp.pad(x, ((0, Bp - B), (0, Dp - D), (0, Np - N)))
    x2d = x.reshape(Bp * Dp, Np)                             # rows = b*Dp + d
    # torch flattens the metric stack feature-major / metric-minor (col d*M + m);
    # the slab rows are metric-major / feature-minor (m*Dp + d): reorder once.
    w3 = jnp.transpose(weight.reshape(O, D, M), (0, 2, 1))   # [O, M, D]
    w3 = jnp.pad(w3, ((0, Oq - O), (0, 0), (0, Dp - D)))
    w_fused = w3.reshape(Oq, M * Dp)
    b_col = jnp.pad(bias, ((0, Oq - O),)).reshape(Oq, 1)

    # ---- generation-aware VMEM budget (v7x: 64 MiB physical; v5e/v6e: 128) ----
    try:
        info = pltpu.get_tpu_info()
        vmem_cap = int(getattr(info, "vmem_capacity_bytes", 64 << 20))
    except Exception:
        vmem_cap = 64 << 20                                  # conservative default
    vmem_ceiling = max(16 << 20, min(int(vmem_cap * 0.8), 100 << 20))

    f32 = 4
    it_x = jnp.dtype(inputs.dtype).itemsize
    it_s = jnp.dtype(supports.dtype).itemsize
    it_w = jnp.dtype(weight.dtype).itemsize
    bytes_sup = n_supports * Np * Np * it_s
    bytes_x_tile = TB * Dp * Np * it_x
    bytes_w = Oq * M * Dp * it_w
    bytes_out_tile = Oq * TB * Np * it_x
    bytes_slab = M * Dp * TB * Np * f32
    bytes_live = 3 * TB * Dp * Np * f32 + Oq * TB * Np * f32
    vmem_est = (2 * bytes_sup + 2 * bytes_x_tile + 2 * bytes_w
                + 2 * bytes_out_tile + bytes_slab + bytes_live)
    vmem_limit = int(min(max(2 * vmem_est + (4 << 20), 16 << 20), vmem_ceiling))

    flops = int(n_tiles * (n_supports * max_step * 2 * (TB * Dp) * Np * Np
                           + 2 * Oq * (M * Dp) * (TB * Np)))
    bytes_accessed = int(bytes_sup + Bp * Dp * Np * it_x + bytes_w + Oq * f32
                         + Bp * Oq * Np * it_x)
    cost = pl.CostEstimate(flops=flops, transcendentals=0,
                           bytes_accessed=bytes_accessed)

    kernel = functools.partial(_graphconv_kernel, n_supports=n_supports,
                               max_step=max_step, tb=TB, dp=Dp)

    def make_call(single_buffer_invariants):
        def inv_spec(shape, index_map):
            # Grid-invariant operands: a single VMEM buffer suffices (the block
            # index never changes; double-buffering only wastes VMEM).
            if single_buffer_invariants:
                return pl.BlockSpec(shape, index_map,
                                    pipeline_mode=pl.Buffered(1))
            return pl.BlockSpec(shape, index_map)

        return pl.pallas_call(
            kernel,
            out_shape=jax.ShapeDtypeStruct((Oq, Bp * Np), inputs.dtype),
            grid=(n_tiles,),
            in_specs=[
                inv_spec((n_supports, Np, Np), lambda i: (0, 0, 0)),
                pl.BlockSpec((TB * Dp, Np), lambda i: (i, 0)),
                inv_spec((Oq, M * Dp), lambda i: (0, 0)),
                inv_spec((Oq, 1), lambda i: (0, 0)),
            ],
            out_specs=pl.BlockSpec((Oq, TB * Np), lambda i: (0, i)),
            scratch_shapes=[pltpu.VMEM((M * Dp, TB * Np), jnp.float32)],
            compiler_params=pltpu.CompilerParams(
                dimension_semantics=("parallel",),
                vmem_limit_bytes=vmem_limit),
            cost_estimate=cost,
        )

    try:
        out2d = make_call(True)(sup_t, x2d, w_fused, b_col)
    except Exception:
        # Installed JAX does not accept pipeline_mode / Buffered(1): fall back
        # to default (double) buffering; semantics are unchanged.
        out2d = make_call(False)(sup_t, x2d, w_fused, b_col)

    out = out2d.reshape(Oq, Bp, Np)[:O, :B, :N]
    return jnp.transpose(out, (1, 2, 0))                     # [B, N, O]


def _reference(inputs, supports_list, weight, bias, max_step):
    """Pure-JAX mirror of the PyTorch forward (for verification)."""
    b, n, d = inputs.shape
    x0 = jnp.transpose(inputs, (1, 2, 0)).reshape(n, -1)      # [N, D*B]
    xs = [x0]
    if max_step != 0:
        for sup in supports_list:                             # each [N, N], shared
            x1 = sup @ x0
            xs.append(x1)
            for _k in range(2, max_step + 1):
                x2 = 2.0 * (sup @ x1) - x0
                xs.append(x2)
                x1, x0 = x2, x1
    x = jnp.stack(xs, axis=0)                                 # [M, N, D*B]
    x = x.reshape(-1, n, d, b)                                # [M, N, D, B]
    x = jnp.transpose(x, (3, 1, 2, 0))                        # torch .transpose(0, 3)
    x = x.reshape(b, n, -1)                                   # [B, N, D*M]
    return x @ weight.T + bias


if __name__ == "__main__":
    # Small, module-consistent shapes.
    B, N, D, O = 2, 16, 32, 32
    n_supports, max_step = 2, 2
    M = max_step * n_supports + 1

    key = jax.random.PRNGKey(0)
    k_x, k_s, k_w, k_b = jax.random.split(key, 4)

    inputs = jax.random.normal(k_x, (B, N, D), dtype=jnp.float32)
    # Dense row-stochastic "supports", shared across the batch (the torch module
    # takes sparse [N, N] tensors; dense with identical semantics).
    supports = jax.nn.softmax(
        jax.random.normal(k_s, (n_supports, N, N), dtype=jnp.float32), axis=-1)
    # Deterministic Linear params: weight [O, D*M], bias [O].
    weight = jax.random.normal(k_w, (O, D * M), dtype=jnp.float32) / jnp.sqrt(D * M)
    bias = jax.random.normal(k_b, (O,), dtype=jnp.float32) * 0.1

    out = batch_graphconv(inputs, supports, weight, bias, max_step=max_step)
    out = jax.block_until_ready(out)

    ref = _reference(inputs, [supports[i] for i in range(n_supports)],
                     weight, bias, max_step)

    assert out.shape == (B, N, O)
    assert jnp.allclose(out, ref, rtol=1e-3, atol=1e-3), \
        f"max abs err {jnp.max(jnp.abs(out - ref))}"
    print("KERNEL_OK")
</pallas_src>

<mosaic_0001>
module attributes {stable_mosaic.version = 11 : i64} {
  func.func @_graphconv_kernel(%arg0: i32, %arg1: memref<2x128x128xf32, #tpu.memory_space<vmem>>, %arg2: memref<64x128xf32, #tpu.memory_space<vmem>>, %arg3: memref<32x160xf32, #tpu.memory_space<vmem>>, %arg4: memref<32x1xf32, #tpu.memory_space<vmem>>, %arg5: memref<32x256xf32, #tpu.memory_space<vmem>>, %arg6: memref<160x256xf32, #tpu.memory_space<vmem>>) attributes {dimension_semantics = [#tpu.dimension_semantics<parallel>], iteration_bounds = array<i64: 1>, scalar_prefetch = 0 : i64, scratch_operands = 1 : i64, tpu.core_type = #tpu.core_type<tc>, window_params = [{pipeline_mode = #tpu.pipeline_mode<synchronous>, transform_indices = @transform_0, window_bounds = array<i64: 2, 128, 128>}, {transform_indices = @transform_1, window_bounds = array<i64: 64, 128>}, {pipeline_mode = #tpu.pipeline_mode<synchronous>, transform_indices = @transform_2, window_bounds = array<i64: 32, 160>}, {pipeline_mode = #tpu.pipeline_mode<synchronous>, transform_indices = @transform_3, window_bounds = array<i64: 32, 1>}, {transform_indices = @transform_4, window_bounds = array<i64: 32, 256>}]} {
    %c0 = arith.constant 0 : index
    %c0_0 = arith.constant 0 : index
    %0 = vector.load %arg2[%c0, %c0_0] : memref<64x128xf32, #tpu.memory_space<vmem>>, vector<64x128xf32>
    %1 = vector.extract_strided_slice %0 {offsets = [0, 0], sizes = [32, 128], strides = [1, 1]} : vector<64x128xf32> to vector<32x128xf32>
    %c0_1 = arith.constant 0 : index
    %c0_2 = arith.constant 0 : index
    %2 = vector.load %arg6[%c0_1, %c0_2] : memref<160x256xf32, #tpu.memory_space<vmem>>, vector<32x128xf32>
    tpu.vector_store %arg6[%c0_1, %c0_2], %1 {strides = array<i32>} : memref<160x256xf32, #tpu.memory_space<vmem>>, vector<32x128xf32>,
    %3 = vector.extract_strided_slice %0 {offsets = [32, 0], sizes = [32, 128], strides = [1, 1]} : vector<64x128xf32> to vector<32x128xf32>
    %c0_3 = arith.constant 0 : index
    %c128 = arith.constant 128 : index
    %4 = vector.load %arg6[%c0_3, %c128] : memref<160x256xf32, #tpu.memory_space<vmem>>, vector<32x128xf32>
    tpu.vector_store %arg6[%c0_3, %c128], %3 {strides = array<i32>} : memref<160x256xf32, #tpu.memory_space<vmem>>, vector<32x128xf32>,
    %c0_4 = arith.constant 0 : index
    %c0_5 = arith.constant 0 : index
    %c0_6 = arith.constant 0 : index
    %5 = vector.load %arg1[%c0_4, %c0_5, %c0_6] : memref<2x128x128xf32, #tpu.memory_space<vmem>>, vector<1x128x128xf32>
    %6 = vector.shape_cast %5 : vector<1x128x128xf32> to vector<128x128xf32>
    %cst = arith.constant dense<0.000000e+00> : vector<64x128xf32>
    %7 = tpu.matmul %0, %6, %cst {dimension_numbers = #tpu.dot_dimension_numbers<[1], [0], [0], [1], [0, 0, 1, 1], [], []>} : vector<64x128xf32>, vector<128x128xf32>, vector<64x128xf32> -> vector<64x128xf32>
    %8 = vector.extract_strided_slice %7 {offsets = [0, 0], sizes = [32, 128], strides = [1, 1]} : vector<64x128xf32> to vector<32x128xf32>
    %c32 = arith.constant 32 : index
    %c0_7 = arith.constant 0 : index
    %9 = vector.load %arg6[%c32, %c0_7] : memref<160x256xf32, #tpu.memory_space<vmem>>, vector<32x128xf32>
    tpu.vector_store %arg6[%c32, %c0_7], %8 {strides = array<i32>} : memref<160x256xf32, #tpu.memory_space<vmem>>, vector<32x128xf32>,
    %10 = vector.extract_strided_slice %7 {offsets = [32, 0], sizes = [32, 128], strides = [1, 1]} : vector<64x128xf32> to vector<32x128xf32>
    %c32_8 = arith.constant 32 : index
    %c128_9 = arith.constant 128 : index
    %11 = vector.load %arg6[%c32_8, %c128_9] : memref<160x256xf32, #tpu.memory_space<vmem>>, vector<32x128xf32>
    tpu.vector_store %arg6[%c32_8, %c128_9], %10 {strides = array<i32>} : memref<160x256xf32, #tpu.memory_space<vmem>>, vector<32x128xf32>,
    %cst_10 = arith.constant dense<0.000000e+00> : vector<64x128xf32>
    %12 = tpu.matmul %7, %6, %cst_10 {dimension_numbers = #tpu.dot_dimension_numbers<[1], [0], [0], [1], [0, 0, 1, 1], [], []>} : vector<64x128xf32>, vector<128x128xf32>, vector<64x128xf32> -> vector<64x128xf32>
    %cst_11 = arith.constant 2.000000e+00 : f32
    %13 = vector.broadcast %cst_11 : f32 to vector<64x128xf32>
    %14 = arith.mulf %13, %12 : vector<64x128xf32>
    %15 = arith.subf %14, %0 : vector<64x128xf32>
    %16 = vector.extract_strided_slice %15 {offsets = [0, 0], sizes = [32, 128], strides = [1, 1]} : vector<64x128xf32> to vector<32x128xf32>
    %c64 = arith.constant 64 : index
    %c0_12 = arith.constant 0 : index
    %17 = vector.load %arg6[%c64, %c0_12] : memref<160x256xf32, #tpu.memory_space<vmem>>, vector<32x128xf32>
    tpu.vector_store %arg6[%c64, %c0_12], %16 {strides = array<i32>} : memref<160x256xf32, #tpu.memory_space<vmem>>, vector<32x128xf32>,
    %18 = vector.extract_strided_slice %15 {offsets = [32, 0], sizes = [32, 128], strides = [1, 1]} : vector<64x128xf32> to vector<32x128xf32>
    %c64_13 = arith.constant 64 : index
    %c128_14 = arith.constant 128 : index
    %19 = vector.load %arg6[%c64_13, %c128_14] : memref<160x256xf32, #tpu.memory_space<vmem>>, vector<32x128xf32>
    tpu.vector_store %arg6[%c64_13, %c128_14], %18 {strides = array<i32>} : memref<160x256xf32, #tpu.memory_space<vmem>>, vector<32x128xf32>,
    %c1 = arith.constant 1 : index
    %c0_15 = arith.constant 0 : index
    %c0_16 = arith.constant 0 : index
    %20 = vector.load %arg1[%c1, %c0_15, %c0_16] : memref<2x128x128xf32, #tpu.memory_space<vmem>>, vector<1x128x128xf32>
    %21 = vector.shape_cast %20 : vector<1x128x128xf32> to vector<128x128xf32>
    %cst_17 = arith.constant dense<0.000000e+00> : vector<64x128xf32>
    %22 = tpu.matmul %7, %21, %cst_17 {dimension_numbers = #tpu.dot_dimension_numbers<[1], [0], [0], [1], [0, 0, 1, 1], [], []>} : vector<64x128xf32>, vector<128x128xf32>, vector<64x128xf32> -> vector<64x128xf32>
    %23 = vector.extract_strided_slice %22 {offsets = [0, 0], sizes = [32, 128], strides = [1, 1]} : vector<64x128xf32> to vector<32x128xf32>
    %c96 = arith.constant 96 : index
    %c0_18 = arith.constant 0 : index
    %24 = vector.load %arg6[%c96, %c0_18] : memref<160x256xf32, #tpu.memory_space<vmem>>, vector<32x128xf32>
    tpu.vector_store %arg6[%c96, %c0_18], %23 {strides = array<i32>} : memref<160x256xf32, #tpu.memory_space<vmem>>, vector<32x128xf32>,
    %25 = vector.extract_strided_slice %22 {offsets = [32, 0], sizes = [32, 128], strides = [1, 1]} : vector<64x128xf32> to vector<32x128xf32>
    %c96_19 = arith.constant 96 : index
    %c128_20 = arith.constant 128 : index
    %26 = vector.load %arg6[%c96_19, %c128_20] : memref<160x256xf32, #tpu.memory_space<vmem>>, vector<32x128xf32>
    tpu.vector_store %arg6[%c96_19, %c128_20], %25 {strides = array<i32>} : memref<160x256xf32, #tpu.memory_space<vmem>>, vector<32x128xf32>,
    %cst_21 = arith.constant dense<0.000000e+00> : vector<64x128xf32>
    %27 = tpu.matmul %22, %21, %cst_21 {dimension_numbers = #tpu.dot_dimension_numbers<[1], [0], [0], [1], [0, 0, 1, 1], [], []>} : vector<64x128xf32>, vector<128x128xf32>, vector<64x128xf32> -> vector<64x128xf32>
    %cst_22 = arith.constant 2.000000e+00 : f32
    %28 = vector.broadcast %cst_22 : f32 to vector<64x128xf32>
    %29 = arith.mulf %28, %27 : vector<64x128xf32>
    %30 = arith.subf %29, %7 : vector<64x128xf32>
    %31 = vector.extract_strided_slice %30 {offsets = [0, 0], sizes = [32, 128], strides = [1, 1]} : vector<64x128xf32> to vector<32x128xf32>
    %c128_23 = arith.constant 128 : index
    %c0_24 = arith.constant 0 : index
    %32 = vector.load %arg6[%c128_23, %c0_24] : memref<160x256xf32, #tpu.memory_space<vmem>>, vector<32x128xf32>
    tpu.vector_store %arg6[%c128_23, %c0_24], %31 {strides = array<i32>} : memref<160x256xf32, #tpu.memory_space<vmem>>, vector<32x128xf32>,
    %33 = vector.extract_strided_slice %30 {offsets = [32, 0], sizes = [32, 128], strides = [1, 1]} : vector<64x128xf32> to vector<32x128xf32>
    %c128_25 = arith.constant 128 : index
    %c128_26 = arith.constant 128 : index
    %34 = vector.load %arg6[%c128_25, %c128_26] : memref<160x256xf32, #tpu.memory_space<vmem>>, vector<32x128xf32>
    tpu.vector_store %arg6[%c128_25, %c128_26], %33 {strides = array<i32>} : memref<160x256xf32, #tpu.memory_space<vmem>>, vector<32x128xf32>,
    %c0_27 = arith.constant 0 : index
    %c0_28 = arith.constant 0 : index
    %35 = vector.load %arg3[%c0_27, %c0_28] : memref<32x160xf32, #tpu.memory_space<vmem>>, vector<32x160xf32>
    %c0_29 = arith.constant 0 : index
    %c0_30 = arith.constant 0 : index
    %36 = vector.load %arg6[%c0_29, %c0_30] : memref<160x256xf32, #tpu.memory_space<vmem>>, vector<160x256xf32>
    %cst_31 = arith.constant dense<0.000000e+00> : vector<32x256xf32>
    %37 = tpu.matmul %35, %36, %cst_31 {dimension_numbers = #tpu.dot_dimension_numbers<[1], [0], [0], [1], [0, 0, 1, 1], [], []>} : vector<32x160xf32>, vector<160x256xf32>, vector<32x256xf32> -> vector<32x256xf32>
    %c0_32 = arith.constant 0 : index
    %c0_33 = arith.constant 0 : index
    %38 = vector.load %arg4[%c0_32, %c0_33] : memref<32x1xf32, #tpu.memory_space<vmem>>, vector<32x1xf32>
    %39 = vector.broadcast %38 : vector<32x1xf32> to vector<32x256xf32>
    %40 = arith.addf %37, %39 : vector<32x256xf32>
    %c0_34 = arith.constant 0 : index
    %c0_35 = arith.constant 0 : index
    %41 = vector.load %arg5[%c0_34, %c0_35] : memref<32x256xf32, #tpu.memory_space<vmem>>, vector<32x256xf32>
    tpu.vector_store %arg5[%c0_34, %c0_35], %40 {strides = array<i32>} : memref<32x256xf32, #tpu.memory_space<vmem>>, vector<32x256xf32>,
    return
  }
  func.func @transform_0(%arg0: i32) -> (i32, i32, i32) {
    %c0_i32 = arith.constant 0 : i32
    %c0_i32_0 = arith.constant 0 : i32
    %c0_i32_1 = arith.constant 0 : i32
    %c0_i32_2 = arith.constant 0 : i32
    return %c0_i32, %c0_i32_0, %c0_i32_1 : i32, i32, i32
  }
  func.func @transform_1(%arg0: i32) -> (i32, i32) {
    %c0_i32 = arith.constant 0 : i32
    %c0_i32_0 = arith.constant 0 : i32
    return %arg0, %c0_i32 : i32, i32
  }
  func.func @transform_2(%arg0: i32) -> (i32, i32) {
    %c0_i32 = arith.constant 0 : i32
    %c0_i32_0 = arith.constant 0 : i32
    %c0_i32_1 = arith.constant 0 : i32
    return %c0_i32, %c0_i32_0 : i32, i32
  }
  func.func @transform_3(%arg0: i32) -> (i32, i32) {
    %c0_i32 = arith.constant 0 : i32
    %c0_i32_0 = arith.constant 0 : i32
    %c0_i32_1 = arith.constant 0 : i32
    return %c0_i32, %c0_i32_0 : i32, i32
  }
  func.func @transform_4(%arg0: i32) -> (i32, i32) {
    %c0_i32 = arith.constant 0 : i32
    %c0_i32_0 = arith.constant 0 : i32
    return %c0_i32, %arg0 : i32, i32
  }
}

module attributes {stable_mosaic.version = 11 : i64} {
  func.func @_graphconv_kernel(%arg0: i32, %arg1: memref<2x128x128xf32, #tpu.memory_space<vmem>>, %arg2: memref<64x128xf32, #tpu.memory_space<vmem>>, %arg3: memref<32x160xf32, #tpu.memory_space<vmem>>, %arg4: memref<32x1xf32, #tpu.memory_space<vmem>>, %arg5: memref<32x256xf32, #tpu.memory_space<vmem>>, %arg6: memref<160x256xf32, #tpu.memory_space<vmem>>) attributes {dimension_semantics = [#tpu.dimension_semantics<parallel>], iteration_bounds = array<i64: 1>, scalar_prefetch = 0 : i64, scratch_operands = 1 : i64, tpu.core_type = #tpu.core_type<tc>, window_params = [{pipeline_mode = #tpu.pipeline_mode<synchronous>, transform_indices = @transform_0, window_bounds = array<i64: 2, 128, 128>}, {transform_indices = @transform_1, window_bounds = array<i64: 64, 128>}, {pipeline_mode = #tpu.pipeline_mode<synchronous>, transform_indices = @transform_2, window_bounds = array<i64: 32, 160>}, {pipeline_mode = #tpu.pipeline_mode<synchronous>, transform_indices = @transform_3, window_bounds = array<i64: 32, 1>}, {transform_indices = @transform_4, window_bounds = array<i64: 32, 256>}]} {
    %c0 = arith.constant 0 : index
    %c0_0 = arith.constant 0 : index
    %0 = vector.load %arg2[%c0, %c0_0] : memref<64x128xf32, #tpu.memory_space<vmem>>, vector<64x128xf32>
    %1 = vector.extract_strided_slice %0 {offsets = [0, 0], sizes = [32, 128], strides = [1, 1]} : vector<64x128xf32> to vector<32x128xf32>
    %c0_1 = arith.constant 0 : index
    %c0_2 = arith.constant 0 : index
    %2 = vector.load %arg6[%c0_1, %c0_2] : memref<160x256xf32, #tpu.memory_space<vmem>>, vector<32x128xf32>
    tpu.vector_store %arg6[%c0_1, %c0_2], %1 {strides = array<i32>} : memref<160x256xf32, #tpu.memory_space<vmem>>, vector<32x128xf32>,
    %3 = vector.extract_strided_slice %0 {offsets = [32, 0], sizes = [32, 128], strides = [1, 1]} : vector<64x128xf32> to vector<32x128xf32>
    %c0_3 = arith.constant 0 : index
    %c128 = arith.constant 128 : index
    %4 = vector.load %arg6[%c0_3, %c128] : memref<160x256xf32, #tpu.memory_space<vmem>>, vector<32x128xf32>
    tpu.vector_store %arg6[%c0_3, %c128], %3 {strides = array<i32>} : memref<160x256xf32, #tpu.memory_space<vmem>>, vector<32x128xf32>,
    %c0_4 = arith.constant 0 : index
    %c0_5 = arith.constant 0 : index
    %c0_6 = arith.constant 0 : index
    %5 = vector.load %arg1[%c0_4, %c0_5, %c0_6] : memref<2x128x128xf32, #tpu.memory_space<vmem>>, vector<1x128x128xf32>
    %6 = vector.shape_cast %5 : vector<1x128x128xf32> to vector<128x128xf32>
    %cst = arith.constant dense<0.000000e+00> : vector<64x128xf32>
    %7 = tpu.matmul %0, %6, %cst {dimension_numbers = #tpu.dot_dimension_numbers<[1], [0], [0], [1], [0, 0, 1, 1], [], []>} : vector<64x128xf32>, vector<128x128xf32>, vector<64x128xf32> -> vector<64x128xf32>
    %8 = vector.extract_strided_slice %7 {offsets = [0, 0], sizes = [32, 128], strides = [1, 1]} : vector<64x128xf32> to vector<32x128xf32>
    %c32 = arith.constant 32 : index
    %c0_7 = arith.constant 0 : index
    %9 = vector.load %arg6[%c32, %c0_7] : memref<160x256xf32, #tpu.memory_space<vmem>>, vector<32x128xf32>
    tpu.vector_store %arg6[%c32, %c0_7], %8 {strides = array<i32>} : memref<160x256xf32, #tpu.memory_space<vmem>>, vector<32x128xf32>,
    %10 = vector.extract_strided_slice %7 {offsets = [32, 0], sizes = [32, 128], strides = [1, 1]} : vector<64x128xf32> to vector<32x128xf32>
    %c32_8 = arith.constant 32 : index
    %c128_9 = arith.constant 128 : index
    %11 = vector.load %arg6[%c32_8, %c128_9] : memref<160x256xf32, #tpu.memory_space<vmem>>, vector<32x128xf32>
    tpu.vector_store %arg6[%c32_8, %c128_9], %10 {strides = array<i32>} : memref<160x256xf32, #tpu.memory_space<vmem>>, vector<32x128xf32>,
    %cst_10 = arith.constant dense<0.000000e+00> : vector<64x128xf32>
    %12 = tpu.matmul %7, %6, %cst_10 {dimension_numbers = #tpu.dot_dimension_numbers<[1], [0], [0], [1], [0, 0, 1, 1], [], []>} : vector<64x128xf32>, vector<128x128xf32>, vector<64x128xf32> -> vector<64x128xf32>
    %cst_11 = arith.constant 2.000000e+00 : f32
    %13 = vector.broadcast %cst_11 : f32 to vector<64x128xf32>
    %14 = arith.mulf %13, %12 : vector<64x128xf32>
    %15 = arith.subf %14, %0 : vector<64x128xf32>
    %16 = vector.extract_strided_slice %15 {offsets = [0, 0], sizes = [32, 128], strides = [1, 1]} : vector<64x128xf32> to vector<32x128xf32>
    %c64 = arith.constant 64 : index
    %c0_12 = arith.constant 0 : index
    %17 = vector.load %arg6[%c64, %c0_12] : memref<160x256xf32, #tpu.memory_space<vmem>>, vector<32x128xf32>
    tpu.vector_store %arg6[%c64, %c0_12], %16 {strides = array<i32>} : memref<160x256xf32, #tpu.memory_space<vmem>>, vector<32x128xf32>,
    %18 = vector.extract_strided_slice %15 {offsets = [32, 0], sizes = [32, 128], strides = [1, 1]} : vector<64x128xf32> to vector<32x128xf32>
    %c64_13 = arith.constant 64 : index
    %c128_14 = arith.constant 128 : index
    %19 = vector.load %arg6[%c64_13, %c128_14] : memref<160x256xf32, #tpu.memory_space<vmem>>, vector<32x128xf32>
    tpu.vector_store %arg6[%c64_13, %c128_14], %18 {strides = array<i32>} : memref<160x256xf32, #tpu.memory_space<vmem>>, vector<32x128xf32>,
    %c1 = arith.constant 1 : index
    %c0_15 = arith.constant 0 : index
    %c0_16 = arith.constant 0 : index
    %20 = vector.load %arg1[%c1, %c0_15, %c0_16] : memref<2x128x128xf32, #tpu.memory_space<vmem>>, vector<1x128x128xf32>
    %21 = vector.shape_cast %20 : vector<1x128x128xf32> to vector<128x128xf32>
    %cst_17 = arith.constant dense<0.000000e+00> : vector<64x128xf32>
    %22 = tpu.matmul %7, %21, %cst_17 {dimension_numbers = #tpu.dot_dimension_numbers<[1], [0], [0], [1], [0, 0, 1, 1], [], []>} : vector<64x128xf32>, vector<128x128xf32>, vector<64x128xf32> -> vector<64x128xf32>
    %23 = vector.extract_strided_slice %22 {offsets = [0, 0], sizes = [32, 128], strides = [1, 1]} : vector<64x128xf32> to vector<32x128xf32>
    %c96 = arith.constant 96 : index
    %c0_18 = arith.constant 0 : index
    %24 = vector.load %arg6[%c96, %c0_18] : memref<160x256xf32, #tpu.memory_space<vmem>>, vector<32x128xf32>
    tpu.vector_store %arg6[%c96, %c0_18], %23 {strides = array<i32>} : memref<160x256xf32, #tpu.memory_space<vmem>>, vector<32x128xf32>,
    %25 = vector.extract_strided_slice %22 {offsets = [32, 0], sizes = [32, 128], strides = [1, 1]} : vector<64x128xf32> to vector<32x128xf32>
    %c96_19 = arith.constant 96 : index
    %c128_20 = arith.constant 128 : index
    %26 = vector.load %arg6[%c96_19, %c128_20] : memref<160x256xf32, #tpu.memory_space<vmem>>, vector<32x128xf32>
    tpu.vector_store %arg6[%c96_19, %c128_20], %25 {strides = array<i32>} : memref<160x256xf32, #tpu.memory_space<vmem>>, vector<32x128xf32>,
    %cst_21 = arith.constant dense<0.000000e+00> : vector<64x128xf32>
    %27 = tpu.matmul %22, %21, %cst_21 {dimension_numbers = #tpu.dot_dimension_numbers<[1], [0], [0], [1], [0, 0, 1, 1], [], []>} : vector<64x128xf32>, vector<128x128xf32>, vector<64x128xf32> -> vector<64x128xf32>
    %cst_22 = arith.constant 2.000000e+00 : f32
    %28 = vector.broadcast %cst_22 : f32 to vector<64x128xf32>
    %29 = arith.mulf %28, %27 : vector<64x128xf32>
    %30 = arith.subf %29, %7 : vector<64x128xf32>
    %31 = vector.extract_strided_slice %30 {offsets = [0, 0], sizes = [32, 128], strides = [1, 1]} : vector<64x128xf32> to vector<32x128xf32>
    %c128_23 = arith.constant 128 : index
    %c0_24 = arith.constant 0 : index
    %32 = vector.load %arg6[%c128_23, %c0_24] : memref<160x256xf32, #tpu.memory_space<vmem>>, vector<32x128xf32>
    tpu.vector_store %arg6[%c128_23, %c0_24], %31 {strides = array<i32>} : memref<160x256xf32, #tpu.memory_space<vmem>>, vector<32x128xf32>,
    %33 = vector.extract_strided_slice %30 {offsets = [32, 0], sizes = [32, 128], strides = [1, 1]} : vector<64x128xf32> to vector<32x128xf32>
    %c128_25 = arith.constant 128 : index
    %c128_26 = arith.constant 128 : index
    %34 = vector.load %arg6[%c128_25, %c128_26] : memref<160x256xf32, #tpu.memory_space<vmem>>, vector<32x128xf32>
    tpu.vector_store %arg6[%c128_25, %c128_26], %33 {strides = array<i32>} : memref<160x256xf32, #tpu.memory_space<vmem>>, vector<32x128xf32>,
    %c0_27 = arith.constant 0 : index
    %c0_28 = arith.constant 0 : index
    %35 = vector.load %arg3[%c0_27, %c0_28] : memref<32x160xf32, #tpu.memory_space<vmem>>, vector<32x160xf32>
    %c0_29 = arith.constant 0 : index
    %c0_30 = arith.constant 0 : index
    %36 = vector.load %arg6[%c0_29, %c0_30] : memref<160x256xf32, #tpu.memory_space<vmem>>, vector<160x256xf32>
    %cst_31 = arith.constant dense<0.000000e+00> : vector<32x256xf32>
    %37 = tpu.matmul %35, %36, %cst_31 {dimension_numbers = #tpu.dot_dimension_numbers<[1], [0], [0], [1], [0, 0, 1, 1], [], []>} : vector<32x160xf32>, vector<160x256xf32>, vector<32x256xf32> -> vector<32x256xf32>
    %c0_32 = arith.constant 0 : index
    %c0_33 = arith.constant 0 : index
    %38 = vector.load %arg4[%c0_32, %c0_33] : memref<32x1xf32, #tpu.memory_space<vmem>>, vector<32x1xf32>
    %39 = vector.broadcast %38 : vector<32x1xf32> to vector<32x256xf32>
    %40 = arith.addf %37, %39 : vector<32x256xf32>
    %c0_34 = arith.constant 0 : index
    %c0_35 = arith.constant 0 : index
    %41 = vector.load %arg5[%c0_34, %c0_35] : memref<32x256xf32, #tpu.memory_space<vmem>>, vector<32x256xf32>
    tpu.vector_store %arg5[%c0_34, %c0_35], %40 {strides = array<i32>} : memref<32x256xf32, #tpu.memory_space<vmem>>, vector<32x256xf32>,
    return
  }
  func.func @transform_0(%arg0: i32) -> (i32, i32, i32) {
    %c0_i32 = arith.constant 0 : i32
    %c0_i32_0 = arith.constant 0 : i32
    %c0_i32_1 = arith.constant 0 : i32
    %c0_i32_2 = arith.constant 0 : i32
    return %c0_i32, %c0_i32_0, %c0_i32_1 : i32, i32, i32
  }
  func.func @transform_1(%arg0: i32) -> (i32, i32) {
    %c0_i32 = arith.constant 0 : i32
    %c0_i32_0 = arith.constant 0 : i32
    return %arg0, %c0_i32 : i32, i32
  }
  func.func @transform_2(%arg0: i32) -> (i32, i32) {
    %c0_i32 = arith.constant 0 : i32
    %c0_i32_0 = arith.constant 0 : i32
    %c0_i32_1 = arith.constant 0 : i32
    return %c0_i32, %c0_i32_0 : i32, i32
  }
  func.func @transform_3(%arg0: i32) -> (i32, i32) {
    %c0_i32 = arith.constant 0 : i32
    %c0_i32_0 = arith.constant 0 : i32
    %c0_i32_1 = arith.constant 0 : i32
    return %c0_i32, %c0_i32_0 : i32, i32
  }
  func.func @transform_4(%arg0: i32) -> (i32, i32) {
    %c0_i32 = arith.constant 0 : i32
    %c0_i32_0 = arith.constant 0 : i32
    return %c0_i32, %arg0 : i32, i32
  }
}

</mosaic_0001>

<bundles_post_ra>
// kernel: tpu_custom_call.1
= control target key start
LH: loop header
LB: loop body
LE: loop exit
PB: predicated region body
PF: predicated region fallthrough
CT: control target
= control target key end

     0   :  { %9 = vsyncpa [#allocation4], 0  ;;  %s1624_s0 = inlined_call_operand.hbm [shape: f32[2,128,128], index: 0, kind: input, shape index: {}]   ;;  %s1625_s1 = inlined_call_operand.hbm [shape: f32[64,128], index: 1, kind: input, shape index: {}]   ;;  %s1626_s2 = inlined_call_operand.hbm [shape: f32[32,160], index: 2, kind: input, shape index: {}]   ;;  %s1627_s3 = inlined_call_operand.vmem [shape: f32[32,1], index: 3, kind: input, shape index: {}]   ;;  %s1628_s4 = inlined_call_operand.hbm [shape: f32[32,256], index: 4, kind: output, shape index: {}]  }
   0x1   :  { %10 = vsyncpa [#allocation7], 0 }
   0x2   :  { %11 = vsyncpa [#allocation5], 0  ;;  %s1341_s15 = smov [#allocation6]   ;;  %s1342_s17 = smov [#allocation3]  }
   0x3   :  { %s29_s16 = sshll.u32 %s1341_s15, 4  ;;  %s17_s18 = sshll.u32 %s1342_s17, 4  ;;  %s30_s16 = int_to_ptr.vmem [resolvable:$true] %s29_s16  ;;  %s1375_s18 = int_to_ptr.vmem [resolvable:$true] %s17_s18 }
   0x4   :  { %s1247_s21 = scalar_lea.hbm %s1625_s1, 1024 }
   0x5   :  { %p1248_p0 = scmp.ne.s32.totalorder %s1625_s1, %s1247_s21  ;;  %p1251_p1 = scmp.lt.u32.totalorder %s1247_s21, %s1625_s1 }
   0x7   :  { %p1253_p2 = pnand %p1251_p1, %p1248_p0 }
   0x9   :  { %1256 = shalt.err (!%p1253_p2)
}
   0xa   :  { %s1257_s26 = scalar_lea.vmem %s30_s16, 1024  ;;  %p1262_p4 = scmp.lt.s32.totalorder %s30_s16, %s30_s16 }
   0xb   :  { %p1258_p3 = scmp.ne.s32.totalorder %s30_s16, %s1257_s26  ;;  %p1263_p5 = scmp.lt.s32.totalorder %s1257_s26, %s1257_s26 }
   0xd   :  { %p1264_p6 = por %p1263_p5, %p1262_p4 }
   0xf   :  { %p1265_p7 = pnand %p1264_p6, %p1258_p3 }
  0x11   :  { %1268 = shalt.err (!%p1265_p7)
}
  0x12   :  { %s1343_s27 = smov 128   ;;  %s1344_s28 = smov 8  }
  0x13   :  { %35 = dma.hbm_to_vmem [thread:$0]  %s1625_s1, 1024, %s30_s16, [#allocation7], %s1343_s27, %s1343_s27, %s1344_s28  }
  0x14   :  { %s1269_s7 = scalar_lea.hbm %s1624_s0, 4096 }
  0x15   :  { %p1270_p8 = scmp.ne.s32.totalorder %s1624_s0, %s1269_s7  ;;  %p1273_p9 = scmp.lt.u32.totalorder %s1269_s7, %s1624_s0 }
  0x17   :  { %p1275_p10 = pnand %p1273_p9, %p1270_p8 }
  0x19   :  { %1278 = shalt.err (!%p1275_p10)
}
  0x1a   :  { %s1279_s12 = scalar_lea.vmem %s1375_s18, 4096  ;;  %p1284_p12 = scmp.lt.s32.totalorder %s1375_s18, %s1375_s18 }
  0x1b   :  { %p1280_p11 = scmp.ne.s32.totalorder %s1375_s18, %s1279_s12  ;;  %p1285_p13 = scmp.lt.s32.totalorder %s1279_s12, %s1279_s12 }
  0x1d   :  { %p1286_p0 = por %p1285_p13, %p1284_p12 }
  0x1f   :  { %p1287_p1 = pnand %p1286_p0, %p1280_p11 }
  0x21   :  { %1290 = shalt.err (!%p1287_p1)
}
  0x22   :  { %23 = dma.hbm_to_vmem [thread:$0]  %s1624_s0, 4096, %s1375_s18, [#allocation4], %s1343_s27, %s1343_s27, %s1344_s28  }
  0x23   :  { %s1345_s14 = smov [#allocation8]   ;;  %s1291_s19 = scalar_lea.hbm %s1626_s2, 1024 }
  0x24   :  { %s41_s15 = sshll.u32 %s1345_s14, 4  ;;  %p1292_p2 = scmp.ne.s32.totalorder %s1626_s2, %s1291_s19  ;;  %s42_s15 = int_to_ptr.vmem [resolvable:$true] %s41_s15 }
  0x25   :  { %p1295_p3 = scmp.lt.u32.totalorder %s1291_s19, %s1626_s2 }
  0x27   :  { %p1297_p4 = pnand %p1295_p3, %p1292_p2 }
  0x29   :  { %1300 = shalt.err (!%p1297_p4)
}
  0x2a   :  { %s1301_s24 = scalar_lea.vmem %s42_s15, 1024  ;;  %p1306_p6 = scmp.lt.s32.totalorder %s42_s15, %s42_s15 }
  0x2b   :  { %p1302_p5 = scmp.ne.s32.totalorder %s42_s15, %s1301_s24  ;;  %p1307_p7 = scmp.lt.s32.totalorder %s1301_s24, %s1301_s24 }
  0x2d   :  { %p1308_p8 = por %p1307_p7, %p1306_p6 }
  0x2f   :  { %p1309_p9 = pnand %p1308_p8, %p1302_p5 }
  0x31   :  { %1312 = shalt.err (!%p1309_p9)
}
  0x32   :  { %s1346_s0 = smov 256   ;;  %s1347_s18 = smov 16  }
  0x33   :  { %47 = dma.hbm_to_vmem [thread:$0]  %s1626_s2, 1024, %s42_s15, [#allocation7], %s1346_s0, %s1346_s0, %s1347_s18  }
  0x34   :  { %1335 = dma.done.wait [#allocation4], 4096  }
  0x35   :  { %1336 = vsyncadd [#allocation4], 4294963200 }
  0x36   :  { %1337 = dma.done.wait [#allocation7], 2048  }
  0x37   :  { %1338 = vsyncadd [#allocation7], 4294965248  ;;  %v75_v0 = vld [vmem:[#allocation3] sm:$0xff]  ;;  %v76_v1 = vld [vmem:[#allocation3 + $0x8] sm:$0xff]  ;;  %vm664_vm0 = vcmask 261120  }
  0x38   :  { %v77_v2 = vld [vmem:[#allocation3 + $0x10] sm:$0xff]  ;;  %v1421_v3 = vpack.c.bf16 %v76_v1, %v75_v0  ;;  %v78_v4 = vld [vmem:[#allocation3 + $0x18] sm:$0xff]  ;;  %v79_v6 = vld [vmem:[#allocation3 + $0x20] sm:$0xff] }
  0x39   :  { %v1423_v5 = vpack.c.bf16 %v78_v4, %v77_v2  ;;  %v80_v7 = vld [vmem:[#allocation3 + $0x28] sm:$0xff]  ;;  %v1430_v9 = vld [vmem:[#allocation6] sm:$0xff]  ;;  %v81_v10 = vld [vmem:[#allocation3 + $0x30] sm:$0xff] }
  0x3a   :  { %1069 = vmatprep.subr.bf16.mxu1 %v1421_v3  ;;  %v1428_v8 = vpack.c.bf16 %v80_v7, %v79_v6  ;;  %v82_v11 = vld [vmem:[#allocation3 + $0x38] sm:$0xff]  ;;  %924 = vmatprep.mubr.f32.mxu1 %v1430_v9  ;;  %v334_v12 = vld [vmem:[#allocation3 + $0x80] sm:$0xff]  ;;  %v335_v13 = vld [vmem:[#allocation3 + $0x88] sm:$0xff] }
  0x3b   :  { %1071 = vmatpush3.bf16.msra.mxu1 %v1421_v3  ;;  %v336_v14 = vld [vmem:[#allocation3 + $0x90] sm:$0xff]  ;;  %v1435_v15 = vpack.c.bf16 %v82_v11, %v81_v10  ;;  %v83_v16 = vld [vmem:[#allocation3 + $0x40] sm:$0xff]  ;;  %v1437_v17 = vpack.c.bf16 %v335_v13, %v334_v12  ;;  %v337_v18 = vld [vmem:[#allocation3 + $0x98] sm:$0xff] }
  0x3c   :  { %1073 = vmatprep.subr.bf16.mxu1 %v1423_v5  ;;  %v84_v19 = vld [vmem:[#allocation3 + $0x48] sm:$0xff]  ;;  %v1439_v20 = vpack.c.bf16 %v337_v18, %v336_v14  ;;  %v338_v21 = vld [vmem:[#allocation3 + $0xa0] sm:$0xff]  ;;  %v85_v24 = vld [vmem:[#allocation3 + $0x50] sm:$0xff] }
  0x3d   :  { %v339_v22 = vld [vmem:[#allocation3 + $0xa8] sm:$0xff]  ;;  %1133 = vmatprep.subr.bf16.mxu0 %v1437_v17  ;;  %v1445_v23 = vpack.c.bf16 %v84_v19, %v83_v16  ;;  %v86_v26 = vld [vmem:[#allocation3 + $0x58] sm:$0xff]  ;;  %v340_v27 = vld [vmem:[#allocation3 + $0xb0] sm:$0xff] }
  0x3e   :  { %1135 = vmatpush3.bf16.msra.mxu0 %v1437_v17  ;;  %v1448_v25 = vpack.c.bf16 %v339_v22, %v338_v21  ;;  %v341_v28 = vld [vmem:[#allocation3 + $0xb8] sm:$0xff]  ;;  %v1453_v29 = vpack.c.bf16 %v86_v26, %v85_v24  ;;  %v87_v30 = vld [vmem:[#allocation3 + $0x60] sm:$0xff]  ;;  %v88_v32 = vld [vmem:[#allocation3 + $0x68] sm:$0xff] }
  0x3f   :  { %1075 = vmatpush3.bf16.msra.mxu1 %v1423_v5  ;;  %1137 = vmatprep.subr.bf16.mxu0 %v1439_v20  ;;  %v1456_v31 = vpack.c.bf16 %v341_v28, %v340_v27  ;;  %v342_v33 = vld [vmem:[#allocation3 + $0xc0] sm:$0xff]  ;;  %v343_v34 = vld [vmem:[#allocation3 + $0xc8] sm:$0xff]  ;;  %v1092_v35 = vpack.c.bf16 %v88_v32, %v87_v30  ;;  %v89_v36 = vld [vmem:[#allocation3 + $0x70] sm:$0xff] }
  0x40   :  { %1077 = vmatprep.subr.bf16.mxu1 %v1428_v8  ;;  %v1462_v37 = vpack.c.bf16 %v343_v34, %v342_v33  ;;  %v90_v38 = vld [vmem:[#allocation3 + $0x78] sm:$0xff]  ;;  %v344_v39 = vld [vmem:[#allocation3 + $0xd0] sm:$0xff]  ;;  %v346_v43 = vld [vmem:[#allocation3 + $0xe0] sm:$0xff] }
  0x41   :  { %v345_v40 = vld [vmem:[#allocation3 + $0xd8] sm:$0xff]  ;;  %v1096_v41 = vpack.c.bf16 %v90_v38, %v89_v36  ;;  %v347_v44 = vld [vmem:[#allocation3 + $0xe8] sm:$0xff]  ;;  %v348_v46 = vld [vmem:[#allocation3 + $0xf0] sm:$0xff] }
  0x42   :  { %1139 = vmatpush3.bf16.msra.mxu0 %v1439_v20  ;;  %v1467_v42 = vpack.c.bf16 %v345_v40, %v344_v39  ;;  %v1471_v45 = vpack.c.bf16 %v347_v44, %v346_v43  ;;  %v349_v47 = vld [vmem:[#allocation3 + $0xf8] sm:$0xff]  ;;  %v1473_v48 = vld [vmem:[#allocation6 + $0x8] sm:$0xff]  ;;  %v1476_v49 = vld [vmem:[#allocation6 + $0x10] sm:$0xff] }
  0x43   :  { %1079 = vmatpush3.bf16.msra.mxu1 %v1428_v8  ;;  %1141 = vmatprep.subr.bf16.mxu0 %v1448_v25  ;;  %v1480_v50 = vpack.c.bf16 %v349_v47, %v348_v46  ;;  %v1484_v51 = vld [vmem:[#allocation6 + $0x18] sm:$0xff]  ;;  %v1487_v52 = vld [vmem:[#allocation6 + $0x20] sm:$0xff]  ;;  %v1494_v53 = vld [vmem:[#allocation6 + $0x28] sm:$0xff]  ;;  %v1198_v57 = vpack.c.bf16 %v1473_v48, %v1430_v9 }
  0x44   :  { %1081 = vmatprep.subr.bf16.mxu1 %v1435_v15  ;;  %v1497_v54 = vld [vmem:[#allocation6 + $0x30] sm:$0xff]  ;;  %v1503_v55 = vld [vmem:[#allocation6 + $0x38] sm:$0xff]  ;;  %v1196_v56 = vpack.c.bf16 %v1494_v53, %v1487_v52  ;;  %v1202_v62 = vpack.c.bf16 %v1484_v51, %v1476_v49 }
  0x45   :  { %v1200_v60 = vpack.c.bf16 %v1503_v55, %v1497_v54 }
  0x46   :  { %1143 = vmatpush3.bf16.msra.mxu0 %v1448_v25 }
  0x47   :  { %1083 = vmatpush3.bf16.msra.mxu1 %v1435_v15  ;;  %1145 = vmatprep.subr.bf16.mxu0 %v1456_v31 }
  0x48   :  { %1085 = vmatprep.subr.bf16.mxu1 %v1445_v23 }
  0x4a   :  { %1147 = vmatpush3.bf16.msra.mxu0 %v1456_v31 }
  0x4b   :  { %1087 = vmatpush3.bf16.msra.mxu1 %v1445_v23  ;;  %1149 = vmatprep.subr.bf16.mxu0 %v1462_v37 }
  0x4c   :  { %1089 = vmatprep.subr.bf16.mxu1 %v1453_v29 }
  0x4e   :  { %1151 = vmatpush3.bf16.msra.mxu0 %v1462_v37 }
  0x4f   :  { %1091 = vmatpush3.bf16.msra.mxu1 %v1453_v29  ;;  %1153 = vmatprep.subr.bf16.mxu0 %v1467_v42 }
  0x50   :  { %1093 = vmatprep.subr.bf16.mxu1 %v1092_v35 }
  0x52   :  { %1155 = vmatpush3.bf16.msra.mxu0 %v1467_v42 }
  0x53   :  { %1095 = vmatpush3.bf16.msra.mxu1 %v1092_v35  ;;  %1157 = vmatprep.subr.bf16.mxu0 %v1471_v45 }
  0x54   :  { %1097 = vmatprep.subr.bf16.mxu1 %v1096_v41 }
  0x56   :  { %1159 = vmatpush3.bf16.msra.mxu0 %v1471_v45 }
  0x57   :  { %1099 = vmatpush3.bf16.msra.mxu1 %v1096_v41  ;;  %1161 = vmatprep.subr.bf16.mxu0 %v1480_v50 }
  0x58   :  { %1101 = vmatprep.subr.bf16.mxu1 %v1421_v3 }
  0x5a   :  { %925 = vmatmul.mubr.f32.vlgmr.msra.gmra.mrb[0].mxu1 %v1473_v48  ;;  %1163 = vmatpush3.bf16.msra.mxu0 %v1480_v50 }
  0x5b   :  { %927 = vmatprep.mubr.f32.mxu1 %v1476_v49  ;;  %1103 = vmatpush3.bf16.msra.mxu1 %v1421_v3 }
  0x5c   :  { %1105 = vmatprep.subr.bf16.mxu1 %v1423_v5  ;;  %1197 = vmatprep.subr.bf16.mxu0 %v1196_v56 }
  0x5e   :  { %928 = vmatmul.mubr.f32.gmra.mrb[2].mxu1 %v1484_v51 }
  0x5f   :  { %930 = vmatprep.mubr.f32.mxu1 %v1487_v52  ;;  %1107 = vmatpush3.bf16.msra.mxu1 %v1423_v5 }
  0x60   :  { %1109 = vmatprep.subr.bf16.mxu1 %v1428_v8 }
  0x62   :  { %931 = vmatmul.mubr.f32.gmra.mrb[4].mxu1 %v1494_v53 }
  0x63   :  { %933 = vmatprep.mubr.f32.mxu1 %v1497_v54  ;;  %1111 = vmatpush3.bf16.msra.mxu1 %v1428_v8 }
  0x64   :  { %1113 = vmatprep.subr.bf16.mxu1 %v1435_v15 }
  0x66   :  { %934 = vmatmul.mubr.f32.gmra.mrb[6].mxu1 %v1503_v55 }
  0x67   :  { %1115 = vmatpush3.bf16.msra.mxu1 %v1435_v15 }
  0x68   :  { %1117 = vmatprep.subr.bf16.mxu1 %v1445_v23 }
  0x6b   :  { %1119 = vmatpush3.bf16.msra.mxu1 %v1445_v23 }
  0x6c   :  { %1121 = vmatprep.subr.bf16.mxu1 %v1453_v29 }
  0x6f   :  { %1123 = vmatpush3.bf16.msra.mxu1 %v1453_v29 }
  0x70   :  { %1125 = vmatprep.subr.bf16.mxu1 %v1092_v35 }
  0x73   :  { %1127 = vmatpush3.bf16.msra.mxu1 %v1092_v35 }
  0x74   :  { %1129 = vmatprep.subr.bf16.mxu1 %v1096_v41 }
  0x77   :  { %1131 = vmatpush3.bf16.msra.mxu1 %v1096_v41 }
  0x78   :  { %1165 = vmatprep.subr.bf16.mxu1 %v1437_v17 }
 0x12d   :  { %v1518_v58 = vpop.f32.mrb[0].mxu1 }
 0x12e   :  { %v1520_v59 = vpop.f32.mrb[1].mxu1 }
 0x12f   :  { %v1206_v61 = vpack.c.bf16 %v1518_v58, %v1520_v59  ;;  %968 = vmatprep.mubr.f32.mxu1 %v1520_v59  ;;  %1012 = vmatprep.mubr.f32.mxu0 %v1520_v59 }
 0x130   :  { %969 = vmatmul.mubr.f32.vlgmr.msra.gmra.mrb[8].mxu1 %v1518_v58  ;;  %1013 = vmatmul.mubr.f32.vlgmr.msra.gmra.mrb[0].mxu0 %v1518_v58 }
 0x131   :  { %v1532_v63 = vpop.f32.mrb[2].mxu1  ;;  %1199 = vmatpush1.bf16.msra.mxu0 %v1198_v57  ;;  %1167 = vmatpush3.bf16.msra.mxu1 %v1437_v17 }
 0x132   :  { %v1535_v0 = vpop.f32.mrb[3].mxu1  ;;  %1201 = vmatprep.subr.bf16.mxu0 %v1200_v60  ;;  %1169 = vmatprep.subr.bf16.mxu1 %v1439_v20 }
 0x133   :  { %v1210_v1 = vpack.c.bf16 %v1532_v63, %v1535_v0  ;;  %971 = vmatprep.mubr.f32.mxu1 %v1535_v0  ;;  %1015 = vmatprep.mubr.f32.mxu0 %v1535_v0 }
 0x134   :  { %972 = vmatmul.mubr.f32.gmra.mrb[10].mxu1 %v1532_v63  ;;  %1016 = vmatmul.mubr.f32.gmra.mrb[2].mxu0 %v1532_v63 }
 0x135   :  { %v1544_v2 = vpop.f32.mrb[4].mxu1  ;;  %1203 = vmatpush1.bf16.msra.mxu0 %v1202_v62  ;;  %1171 = vmatpush3.bf16.msra.mxu1 %v1439_v20 }
 0x136   :  { %v1547_v3 = vpop.f32.mrb[5].mxu1  ;;  %1173 = vmatprep.subr.bf16.mxu1 %v1448_v25 }
 0x137   :  { %974 = vmatprep.mubr.f32.mxu1 %v1547_v3  ;;  %1018 = vmatprep.mubr.f32.mxu0 %v1547_v3  ;;  %v1204_v4 = vpack.c.bf16 %v1544_v2, %v1547_v3 }
 0x138   :  { %975 = vmatmul.mubr.f32.gmra.mrb[12].mxu1 %v1544_v2  ;;  %1019 = vmatmul.mubr.f32.gmra.mrb[4].mxu0 %v1544_v2 }
 0x139   :  { %v1556_v5 = vpop.f32.mrb[6].mxu1  ;;  %1205 = vmatprep.subr.bf16.mxu0 %v1204_v4  ;;  %1175 = vmatpush3.bf16.msra.mxu1 %v1448_v25 }
 0x13a   :  { %v1559_v6 = vpop.f32.mrb[7].mxu1  ;;  %1207 = vmatpush1.bf16.msra.mxu0 %v1206_v61  ;;  %1177 = vmatprep.subr.bf16.mxu1 %v1456_v31 }
 0x13b   :  { %977 = vmatprep.mubr.f32.mxu1 %v1559_v6  ;;  %1021 = vmatprep.mubr.f32.mxu0 %v1559_v6  ;;  %v1208_v7 = vpack.c.bf16 %v1556_v5, %v1559_v6 }
 0x13c   :  { %978 = vmatmul.mubr.f32.gmra.mrb[14].mxu1 %v1556_v5  ;;  %1022 = vmatmul.mubr.f32.gmra.mrb[6].mxu0 %v1556_v5 }
 0x13d   :  { %1209 = vmatprep.subr.bf16.mxu0 %v1208_v7  ;;  %1179 = vmatpush3.bf16.msra.mxu1 %v1456_v31 }
 0x13e   :  { %1211 = vmatpush1.bf16.msra.mxu0 %v1210_v1  ;;  %1181 = vmatprep.subr.bf16.mxu1 %v1462_v37 }
 0x141   :  { %1183 = vmatpush3.bf16.msra.mxu1 %v1462_v37 }
 0x142   :  { %1185 = vmatprep.subr.bf16.mxu1 %v1467_v42 }
 0x145   :  { %1187 = vmatpush3.bf16.msra.mxu1 %v1467_v42 }
 0x146   :  { %1189 = vmatprep.subr.bf16.mxu1 %v1471_v45 }
 0x149   :  { %1191 = vmatpush3.bf16.msra.mxu1 %v1471_v45 }
 0x14a   :  { %1193 = vmatprep.subr.bf16.mxu1 %v1480_v50 }
 0x14d   :  { %1195 = vmatpush3.bf16.msra.mxu1 %v1480_v50  ;;  %v642_v50 = vld [vmem:[%s1627_s3 + $0x10] sm:$0xff] }
 0x203   :  { %v970_v8 = vpop.f32.mrb[8].mxu1  ;;  %v1014_v10 = vpop.f32.mrb[0].mxu0 }
 0x204   :  { %v310_v11 = vmul.f32 2.0, %v970_v8  ;;  %v270_v12 = vpop.f32.mrb[9].mxu1  ;;  %v416_v13 = vpop.f32.mrb[1].mxu0 }
 0x205   :  { %v309_v14 = vmul.f32 2.0, %v270_v12  ;;  %v1222_v15 = vpack.c.bf16 %v1014_v10, %v416_v13  ;;  %1056 = vmatprep.mubr.f32.mxu1 %v416_v13 }
 0x206   :  { %v318_v16 = vsub.f32 %v310_v11, %v1473_v48  ;;  %1057 = vmatmul.mubr.f32.vlgmr.msra.gmra.mrb[16].mxu1 %v1014_v10  ;;  %v593_v48 = vld [vmem:[#allocation8 + $0x8] sm:$0xff] }
 0x207   :  { %v317_v17 = vsub.f32 %v309_v14, %v1430_v9  ;;  %v973_v18 = vpop.f32.mrb[10].mxu1  ;;  %v1017_v19 = vpop.f32.mrb[2].mxu0  ;;  %792 = vmatprep.mubr.msk.f32.mxu0 %vm664_vm0, %v593_v48 }
 0x208   :  { %v312_v20 = vmul.f32 2.0, %v973_v18  ;;  %v280_v21 = vpop.f32.mrb[11].mxu1  ;;  %v426_v22 = vpop.f32.mrb[3].mxu0 }
 0x209   :  { %v1214_v23 = vpack.c.bf16 %v318_v16, %v317_v17  ;;  %v311_v24 = vmul.f32 2.0, %v280_v21  ;;  %v1226_v25 = vpack.c.bf16 %v1017_v19, %v426_v22  ;;  %1059 = vmatprep.mubr.f32.mxu1 %v426_v22 }
 0x20a   :  { %v320_v26 = vsub.f32 %v312_v20, %v1484_v51  ;;  %1060 = vmatmul.mubr.f32.gmra.mrb[18].mxu1 %v1017_v19  ;;  %v1348_v51 = vmov 0  }
 0x20b   :  { %v319_v27 = vsub.f32 %v311_v24, %v1476_v49  ;;  %v976_v28 = vpop.f32.mrb[12].mxu1  ;;  %v1020_v29 = vpop.f32.mrb[4].mxu0  ;;  %v640_v49 = vld [vmem:[%s1627_s3] sm:$0xff]  ;;  %1245 = vset.pattern.permute.xlu0 %v1348_v51  ;;  %1246 = vset.pattern.permute.xlu1 %v1348_v51  ;;  %v595_v24 = vld [vmem:[#allocation8 + $0x18] sm:$0xff] }
 0x20c   :  { %v314_v30 = vmul.f32 2.0, %v976_v28  ;;  %v290_v31 = vpop.f32.mrb[13].mxu1  ;;  %v436_v32 = vpop.f32.mrb[5].mxu0  ;;  %646 = vperm.xlu0 %1245, %v640_v49   ;;  %656 = vperm.xlu1 %1246, %v642_v50  }
 0x20d   :  { %v1218_v9 = vpack.c.bf16 %v320_v26, %v319_v27  ;;  %v313_v33 = vmul.f32 2.0, %v290_v31  ;;  %v1220_v34 = vpack.c.bf16 %v1020_v29, %v436_v32  ;;  %1062 = vmatprep.mubr.f32.mxu1 %v436_v32  ;;  %v599_v26 = vld [vmem:[#allocation8 + $0x38] sm:$0xff] }
 0x20e   :  { %v322_v35 = vsub.f32 %v314_v30, %v1494_v53  ;;  %1063 = vmatmul.mubr.f32.gmra.mrb[20].mxu1 %v1020_v29  ;;  %v643_v53 = vld [vmem:[%s1627_s3 + $0x18] sm:$0xff] }
 0x20f   :  { %v321_v36 = vsub.f32 %v313_v33, %v1487_v52  ;;  %v979_v37 = vpop.f32.mrb[14].mxu1  ;;  %v1023_v38 = vpop.f32.mrb[6].mxu0  ;;  %v641_v52 = vld [vmem:[%s1627_s3 + $0x8] sm:$0xff]  ;;  %s1349_s3 = smov [#allocation9]  }
 0x210   :  { %v316_v39 = vmul.f32 2.0, %v979_v37  ;;  %v300_v40 = vpop.f32.mrb[15].mxu1  ;;  %v446_v41 = vpop.f32.mrb[7].mxu0  ;;  %651 = vperm.xlu0 %1245, %v641_v52   ;;  %661 = vperm.xlu1 %1246, %v643_v53   ;;  %s779_s8 = sshll.u32 %s1349_s3, 4  ;;  %s780_s8 = int_to_ptr.vmem [resolvable:$true] %s779_s8 }
 0x211   :  { %v315_v42 = vmul.f32 2.0, %v300_v40  ;;  %v1224_v43 = vpack.c.bf16 %v1023_v38, %v446_v41  ;;  %1065 = vmatprep.mubr.f32.mxu1 %v446_v41  ;;  %v1212_v44 = vpack.c.bf16 %v322_v35, %v321_v36  ;;  %s1313_s9 = scalar_lea.vmem %s780_s8, 1024  ;;  %p1318_p11 = scmp.lt.s32.totalorder %s780_s8, %s780_s8 }
 0x212   :  { %v324_v45 = vsub.f32 %v316_v39, %v1503_v55  ;;  %1066 = vmatmul.mubr.f32.gmra.mrb[22].mxu1 %v1023_v38  ;;  %p1314_p10 = scmp.ne.s32.totalorder %s780_s8, %s1313_s9  ;;  %p1319_p12 = scmp.lt.s32.totalorder %s1313_s9, %s1313_s9 }
 0x213   :  { %v323_v46 = vsub.f32 %v315_v42, %v1497_v54  ;;  %1213 = vmatprep.subr.bf16.mxu0 %v1212_v44 }
 0x214   :  { %1215 = vmatpush1.bf16.msra.mxu0 %v1214_v23  ;;  %v592_v23 = vld [vmem:[#allocation8] sm:$0xff]  ;;  %p1320_p13 = por %p1319_p12, %p1318_p11 }
 0x215   :  { %v1216_v47 = vpack.c.bf16 %v324_v45, %v323_v46 }
 0x216   :  { %p1321_p0 = pnand %p1320_p13, %p1314_p10 }
 0x217   :  { %1217 = vmatprep.subr.bf16.mxu0 %v1216_v47 }
 0x218   :  { %1219 = vmatpush1.bf16.msra.mxu0 %v1218_v9 }
 0x219   :  { %1221 = vmatprep.subr.bf16.mxu0 %v1220_v34 }
 0x21c   :  { %1223 = vmatpush1.bf16.msra.mxu0 %v1222_v15 }
 0x21d   :  { %1225 = vmatprep.subr.bf16.mxu0 %v1224_v43 }
 0x220   :  { %1227 = vmatpush1.bf16.msra.mxu0 %v1226_v25  ;;  %v596_v25 = vld [vmem:[#allocation8 + $0x20] sm:$0xff] }
 0x28b   :  { %v657_v34 = vpop.permute.xlu1 %656 }
 0x28f   :  { %v662_v40 = vpop.permute.xlu1 %661 }
 0x2d9   :  { %v1058_v54 = vpop.f32.mrb[16].mxu1 }
 0x2da   :  { %v569_v55 = vmul.f32 2.0, %v1058_v54  ;;  %v529_v56 = vpop.f32.mrb[17].mxu1 }
 0x2db   :  { %v568_v57 = vmul.f32 2.0, %v529_v56 }
 0x2dc   :  { %v577_v60 = vsub.f32 %v569_v55, %v1518_v58 }
 0x2dd   :  { %v576_v61 = vsub.f32 %v568_v57, %v1520_v59  ;;  %v1061_v62 = vpop.f32.mrb[18].mxu1 }
 0x2de   :  { %v571_v1 = vmul.f32 2.0, %v1061_v62  ;;  %v539_v4 = vpop.f32.mrb[19].mxu1 }
 0x2df   :  { %v1230_v7 = vpack.c.bf16 %v577_v60, %v576_v61  ;;  %v570_v8 = vmul.f32 2.0, %v539_v4 }
 0x2e0   :  { %v579_v10 = vsub.f32 %v571_v1, %v1532_v63 }
 0x2e1   :  { %v578_v11 = vsub.f32 %v570_v8, %v1535_v0  ;;  %v1064_v12 = vpop.f32.mrb[20].mxu1 }
 0x2e2   :  { %v573_v13 = vmul.f32 2.0, %v1064_v12  ;;  %v549_v14 = vpop.f32.mrb[21].mxu1 }
 0x2e3   :  { %v1234_v15 = vpack.c.bf16 %v579_v10, %v578_v11  ;;  %v572_v16 = vmul.f32 2.0, %v549_v14 }
 0x2e4   :  { %v581_v17 = vsub.f32 %v573_v13, %v1544_v2  ;;  %v594_v2 = vld [vmem:[#allocation8 + $0x10] sm:$0xff] }
 0x2e5   :  { %v580_v58 = vsub.f32 %v572_v16, %v1547_v3  ;;  %v1067_v18 = vpop.f32.mrb[22].mxu1  ;;  %v597_v3 = vld [vmem:[#allocation8 + $0x28] sm:$0xff] }
 0x2e6   :  { %v575_v59 = vmul.f32 2.0, %v1067_v18  ;;  %v559_v19 = vpop.f32.mrb[23].mxu1 }
 0x2e7   :  { %v574_v20 = vmul.f32 2.0, %v559_v19  ;;  %v1228_v21 = vpack.c.bf16 %v581_v17, %v580_v58 }
 0x2e8   :  { %v583_v22 = vsub.f32 %v575_v59, %v1556_v5  ;;  %v598_v5 = vld [vmem:[#allocation8 + $0x30] sm:$0xff] }
 0x2e9   :  { %v582_v63 = vsub.f32 %v574_v20, %v1559_v6  ;;  %1229 = vmatprep.subr.bf16.mxu0 %v1228_v21  ;;  %v647_v6 = vpop.permute.xlu0 %646 }
 0x2ea   :  { %1231 = vmatpush1.bf16.msra.mxu0 %v1230_v7 }
 0x2eb   :  { %v1232_v0 = vpack.c.bf16 %v583_v22, %v582_v63 }
 0x2ed   :  { %1233 = vmatprep.subr.bf16.mxu0 %v1232_v0  ;;  %v652_v31 = vpop.permute.xlu0 %651 }
 0x2ee   :  { %1235 = vmatpush1.bf16.msra.mxu0 %v1234_v15 }
 0x2f1   :  { %742 = vmatmul.mubr.f32.vlgmr.msra.gmra.mrb[8].mxu0 %v592_v23 }
 0x2f2   :  { %793 = vmatprep.mubr.msk.f32.mxu0 %vm664_vm0, %v595_v24 }
 0x2f5   :  { %748 = vmatmul.mubr.f32.gmra.mrb[10].mxu0 %v594_v2 }
 0x2f6   :  { %794 = vmatprep.mubr.msk.f32.mxu0 %vm664_vm0, %v597_v3 }
 0x2f9   :  { %754 = vmatmul.mubr.f32.gmra.mrb[12].mxu0 %v596_v25 }
 0x2fa   :  { %795 = vmatprep.mubr.msk.f32.mxu0 %vm664_vm0, %v599_v26 }
 0x2fd   :  { %760 = vmatmul.mubr.f32.gmra.mrb[14].mxu0 %v598_v5 }
 0x3c4   :  { %v743_v27 = vpop.f32.mrb[8].mxu0 }
 0x3c5   :  { %v744_v28 = vadd.f32 %v743_v27, %v647_v6  ;;  %v745_v29 = vpop.f32.mrb[9].mxu0 }
 0x3c6   :  { %v746_v30 = vadd.f32 %v745_v29, %v647_v6 }
 0x3c7   :  { %766 = vst [vmem:[#allocation9] sm:$0xff] %v744_v28 }
 0x3c8   :  { %767 = vst [vmem:[#allocation9 + $0x8] sm:$0xff] %v746_v30  ;;  %v749_v32 = vpop.f32.mrb[10].mxu0 }
 0x3c9   :  { %v750_v9 = vadd.f32 %v749_v32, %v652_v31  ;;  %v751_v33 = vpop.f32.mrb[11].mxu0 }
 0x3ca   :  { %v752_v35 = vadd.f32 %v751_v33, %v652_v31 }
 0x3cb   :  { %768 = vst [vmem:[#allocation9 + $0x10] sm:$0xff] %v750_v9 }
 0x3cc   :  { %769 = vst [vmem:[#allocation9 + $0x18] sm:$0xff] %v752_v35  ;;  %v755_v36 = vpop.f32.mrb[12].mxu0 }
 0x3cd   :  { %v756_v37 = vadd.f32 %v755_v36, %v657_v34  ;;  %v757_v38 = vpop.f32.mrb[13].mxu0 }
 0x3ce   :  { %v758_v39 = vadd.f32 %v757_v38, %v657_v34 }
 0x3cf   :  { %770 = vst [vmem:[#allocation9 + $0x20] sm:$0xff] %v756_v37 }
 0x3d0   :  { %771 = vst [vmem:[#allocation9 + $0x28] sm:$0xff] %v758_v39  ;;  %v761_v41 = vpop.f32.mrb[14].mxu0 }
 0x3d1   :  { %v762_v42 = vadd.f32 %v761_v41, %v662_v40  ;;  %v763_v43 = vpop.f32.mrb[15].mxu0 }
 0x3d2   :  { %v764_v44 = vadd.f32 %v763_v43, %v662_v40 }
 0x3d3   :  { %772 = vst [vmem:[#allocation9 + $0x30] sm:$0xff] %v762_v42 }
 0x3d4   :  { %773 = vst [vmem:[#allocation9 + $0x38] sm:$0xff] %v764_v44 }
 0x3d5   :  { %1324 = shalt.err (!%p1321_p0)
}
 0x3d6   :  { %s1325_s12 = scalar_lea.hbm %s1628_s4, 1024 }
 0x3d7   :  { %p1326_p1 = scmp.ne.s32.totalorder %s1628_s4, %s1325_s12  ;;  %p1329_p2 = scmp.lt.u32.totalorder %s1325_s12, %s1628_s4 }
 0x3d9   :  { %p1331_p3 = pnand %p1329_p2, %p1326_p1 }
 0x3db   :  { %1334 = shalt.err (!%p1331_p3)
}
 0x3dc   :  { %785 = dma.vmem_to_hbm [thread:$0]  %s780_s8, 1024, %s1628_s4, [#allocation5], %s1346_s0, %s1346_s0, %s1347_s18  }
 0x3dd   :  { %1339 = dma.done.wait [#allocation5], 1024  }
 0x3de   :  { %1340 = vsyncadd [#allocation5], 4294966272 }
 0x3df   :  { %789 = vsyncpa [#allocation4], 1 }
 0x3e0   :  { %790 = vsyncpa [#allocation7], 1 }
 0x3e1   :  { %791 = vsyncpa [#allocation5], 1 }

// kernel: tpu_custom_call.1
= control target key start
LH: loop header
LB: loop body
LE: loop exit
PB: predicated region body
PF: predicated region fallthrough
CT: control target
= control target key end

     0   :  { %9 = vsyncpa [#allocation4], 0  ;;  %s1624_s0 = inlined_call_operand.hbm [shape: f32[2,128,128], index: 0, kind: input, shape index: {}]   ;;  %s1625_s1 = inlined_call_operand.hbm [shape: f32[64,128], index: 1, kind: input, shape index: {}]   ;;  %s1626_s2 = inlined_call_operand.hbm [shape: f32[32,160], index: 2, kind: input, shape index: {}]   ;;  %s1627_s3 = inlined_call_operand.vmem [shape: f32[32,1], index: 3, kind: input, shape index: {}]   ;;  %s1628_s4 = inlined_call_operand.hbm [shape: f32[32,256], index: 4, kind: output, shape index: {}]  }
   0x1   :  { %10 = vsyncpa [#allocation7], 0 }
   0x2   :  { %11 = vsyncpa [#allocation5], 0  ;;  %s1341_s15 = smov [#allocation6]   ;;  %s1342_s17 = smov [#allocation3]  }
   0x3   :  { %s29_s16 = sshll.u32 %s1341_s15, 4  ;;  %s17_s18 = sshll.u32 %s1342_s17, 4  ;;  %s30_s16 = int_to_ptr.vmem [resolvable:$true] %s29_s16  ;;  %s1375_s18 = int_to_ptr.vmem [resolvable:$true] %s17_s18 }
   0x4   :  { %s1247_s21 = scalar_lea.hbm %s1625_s1, 1024 }
   0x5   :  { %p1248_p0 = scmp.ne.s32.totalorder %s1625_s1, %s1247_s21  ;;  %p1251_p1 = scmp.lt.u32.totalorder %s1247_s21, %s1625_s1 }
   0x7   :  { %p1253_p2 = pnand %p1251_p1, %p1248_p0 }
   0x9   :  { %1256 = shalt.err (!%p1253_p2)
}
   0xa   :  { %s1257_s26 = scalar_lea.vmem %s30_s16, 1024  ;;  %p1262_p4 = scmp.lt.s32.totalorder %s30_s16, %s30_s16 }
   0xb   :  { %p1258_p3 = scmp.ne.s32.totalorder %s30_s16, %s1257_s26  ;;  %p1263_p5 = scmp.lt.s32.totalorder %s1257_s26, %s1257_s26 }
   0xd   :  { %p1264_p6 = por %p1263_p5, %p1262_p4 }
   0xf   :  { %p1265_p7 = pnand %p1264_p6, %p1258_p3 }
  0x11   :  { %1268 = shalt.err (!%p1265_p7)
}
  0x12   :  { %s1343_s27 = smov 128   ;;  %s1344_s28 = smov 8  }
  0x13   :  { %35 = dma.hbm_to_vmem [thread:$0]  %s1625_s1, 1024, %s30_s16, [#allocation7], %s1343_s27, %s1343_s27, %s1344_s28  }
  0x14   :  { %s1269_s7 = scalar_lea.hbm %s1624_s0, 4096 }
  0x15   :  { %p1270_p8 = scmp.ne.s32.totalorder %s1624_s0, %s1269_s7  ;;  %p1273_p9 = scmp.lt.u32.totalorder %s1269_s7, %s1624_s0 }
  0x17   :  { %p1275_p10 = pnand %p1273_p9, %p1270_p8 }
  0x19   :  { %1278 = shalt.err (!%p1275_p10)
}
  0x1a   :  { %s1279_s12 = scalar_lea.vmem %s1375_s18, 4096  ;;  %p1284_p12 = scmp.lt.s32.totalorder %s1375_s18, %s1375_s18 }
  0x1b   :  { %p1280_p11 = scmp.ne.s32.totalorder %s1375_s18, %s1279_s12  ;;  %p1285_p13 = scmp.lt.s32.totalorder %s1279_s12, %s1279_s12 }
  0x1d   :  { %p1286_p0 = por %p1285_p13, %p1284_p12 }
  0x1f   :  { %p1287_p1 = pnand %p1286_p0, %p1280_p11 }
  0x21   :  { %1290 = shalt.err (!%p1287_p1)
}
  0x22   :  { %23 = dma.hbm_to_vmem [thread:$0]  %s1624_s0, 4096, %s1375_s18, [#allocation4], %s1343_s27, %s1343_s27, %s1344_s28  }
  0x23   :  { %s1345_s14 = smov [#allocation8]   ;;  %s1291_s19 = scalar_lea.hbm %s1626_s2, 1024 }
  0x24   :  { %s41_s15 = sshll.u32 %s1345_s14, 4  ;;  %p1292_p2 = scmp.ne.s32.totalorder %s1626_s2, %s1291_s19  ;;  %s42_s15 = int_to_ptr.vmem [resolvable:$true] %s41_s15 }
  0x25   :  { %p1295_p3 = scmp.lt.u32.totalorder %s1291_s19, %s1626_s2 }
  0x27   :  { %p1297_p4 = pnand %p1295_p3, %p1292_p2 }
  0x29   :  { %1300 = shalt.err (!%p1297_p4)
}
  0x2a   :  { %s1301_s24 = scalar_lea.vmem %s42_s15, 1024  ;;  %p1306_p6 = scmp.lt.s32.totalorder %s42_s15, %s42_s15 }
  0x2b   :  { %p1302_p5 = scmp.ne.s32.totalorder %s42_s15, %s1301_s24  ;;  %p1307_p7 = scmp.lt.s32.totalorder %s1301_s24, %s1301_s24 }
  0x2d   :  { %p1308_p8 = por %p1307_p7, %p1306_p6 }
  0x2f   :  { %p1309_p9 = pnand %p1308_p8, %p1302_p5 }
  0x31   :  { %1312 = shalt.err (!%p1309_p9)
}
  0x32   :  { %s1346_s0 = smov 256   ;;  %s1347_s18 = smov 16  }
  0x33   :  { %47 = dma.hbm_to_vmem [thread:$0]  %s1626_s2, 1024, %s42_s15, [#allocation7], %s1346_s0, %s1346_s0, %s1347_s18  }
  0x34   :  { %1335 = dma.done.wait [#allocation4], 4096  }
  0x35   :  { %1336 = vsyncadd [#allocation4], 4294963200 }
  0x36   :  { %1337 = dma.done.wait [#allocation7], 2048  }
  0x37   :  { %1338 = vsyncadd [#allocation7], 4294965248  ;;  %v75_v0 = vld [vmem:[#allocation3] sm:$0xff]  ;;  %v76_v1 = vld [vmem:[#allocation3 + $0x8] sm:$0xff]  ;;  %vm664_vm0 = vcmask 261120  }
  0x38   :  { %v77_v2 = vld [vmem:[#allocation3 + $0x10] sm:$0xff]  ;;  %v1421_v3 = vpack.c.bf16 %v76_v1, %v75_v0  ;;  %v78_v4 = vld [vmem:[#allocation3 + $0x18] sm:$0xff]  ;;  %v79_v6 = vld [vmem:[#allocation3 + $0x20] sm:$0xff] }
  0x39   :  { %v1423_v5 = vpack.c.bf16 %v78_v4, %v77_v2  ;;  %v80_v7 = vld [vmem:[#allocation3 + $0x28] sm:$0xff]  ;;  %v1430_v9 = vld [vmem:[#allocation6] sm:$0xff]  ;;  %v81_v10 = vld [vmem:[#allocation3 + $0x30] sm:$0xff] }
  0x3a   :  { %1069 = vmatprep.subr.bf16.mxu1 %v1421_v3  ;;  %v1428_v8 = vpack.c.bf16 %v80_v7, %v79_v6  ;;  %v82_v11 = vld [vmem:[#allocation3 + $0x38] sm:$0xff]  ;;  %924 = vmatprep.mubr.f32.mxu1 %v1430_v9  ;;  %v334_v12 = vld [vmem:[#allocation3 + $0x80] sm:$0xff]  ;;  %v335_v13 = vld [vmem:[#allocation3 + $0x88] sm:$0xff] }
  0x3b   :  { %1071 = vmatpush3.bf16.msra.mxu1 %v1421_v3  ;;  %v336_v14 = vld [vmem:[#allocation3 + $0x90] sm:$0xff]  ;;  %v1435_v15 = vpack.c.bf16 %v82_v11, %v81_v10  ;;  %v83_v16 = vld [vmem:[#allocation3 + $0x40] sm:$0xff]  ;;  %v1437_v17 = vpack.c.bf16 %v335_v13, %v334_v12  ;;  %v337_v18 = vld [vmem:[#allocation3 + $0x98] sm:$0xff] }
  0x3c   :  { %1073 = vmatprep.subr.bf16.mxu1 %v1423_v5  ;;  %v84_v19 = vld [vmem:[#allocation3 + $0x48] sm:$0xff]  ;;  %v1439_v20 = vpack.c.bf16 %v337_v18, %v336_v14  ;;  %v338_v21 = vld [vmem:[#allocation3 + $0xa0] sm:$0xff]  ;;  %v85_v24 = vld [vmem:[#allocation3 + $0x50] sm:$0xff] }
  0x3d   :  { %v339_v22 = vld [vmem:[#allocation3 + $0xa8] sm:$0xff]  ;;  %1133 = vmatprep.subr.bf16.mxu0 %v1437_v17  ;;  %v1445_v23 = vpack.c.bf16 %v84_v19, %v83_v16  ;;  %v86_v26 = vld [vmem:[#allocation3 + $0x58] sm:$0xff]  ;;  %v340_v27 = vld [vmem:[#allocation3 + $0xb0] sm:$0xff] }
  0x3e   :  { %1135 = vmatpush3.bf16.msra.mxu0 %v1437_v17  ;;  %v1448_v25 = vpack.c.bf16 %v339_v22, %v338_v21  ;;  %v341_v28 = vld [vmem:[#allocation3 + $0xb8] sm:$0xff]  ;;  %v1453_v29 = vpack.c.bf16 %v86_v26, %v85_v24  ;;  %v87_v30 = vld [vmem:[#allocation3 + $0x60] sm:$0xff]  ;;  %v88_v32 = vld [vmem:[#allocation3 + $0x68] sm:$0xff] }
  0x3f   :  { %1075 = vmatpush3.bf16.msra.mxu1 %v1423_v5  ;;  %1137 = vmatprep.subr.bf16.mxu0 %v1439_v20  ;;  %v1456_v31 = vpack.c.bf16 %v341_v28, %v340_v27  ;;  %v342_v33 = vld [vmem:[#allocation3 + $0xc0] sm:$0xff]  ;;  %v343_v34 = vld [vmem:[#allocation3 + $0xc8] sm:$0xff]  ;;  %v1092_v35 = vpack.c.bf16 %v88_v32, %v87_v30  ;;  %v89_v36 = vld [vmem:[#allocation3 + $0x70] sm:$0xff] }
  0x40   :  { %1077 = vmatprep.subr.bf16.mxu1 %v1428_v8  ;;  %v1462_v37 = vpack.c.bf16 %v343_v34, %v342_v33  ;;  %v90_v38 = vld [vmem:[#allocation3 + $0x78] sm:$0xff]  ;;  %v344_v39 = vld [vmem:[#allocation3 + $0xd0] sm:$0xff]  ;;  %v346_v43 = vld [vmem:[#allocation3 + $0xe0] sm:$0xff] }
  0x41   :  { %v345_v40 = vld [vmem:[#allocation3 + $0xd8] sm:$0xff]  ;;  %v1096_v41 = vpack.c.bf16 %v90_v38, %v89_v36  ;;  %v347_v44 = vld [vmem:[#allocation3 + $0xe8] sm:$0xff]  ;;  %v348_v46 = vld [vmem:[#allocation3 + $0xf0] sm:$0xff] }
  0x42   :  { %1139 = vmatpush3.bf16.msra.mxu0 %v1439_v20  ;;  %v1467_v42 = vpack.c.bf16 %v345_v40, %v344_v39  ;;  %v1471_v45 = vpack.c.bf16 %v347_v44, %v346_v43  ;;  %v349_v47 = vld [vmem:[#allocation3 + $0xf8] sm:$0xff]  ;;  %v1473_v48 = vld [vmem:[#allocation6 + $0x8] sm:$0xff]  ;;  %v1476_v49 = vld [vmem:[#allocation6 + $0x10] sm:$0xff] }
  0x43   :  { %1079 = vmatpush3.bf16.msra.mxu1 %v1428_v8  ;;  %1141 = vmatprep.subr.bf16.mxu0 %v1448_v25  ;;  %v1480_v50 = vpack.c.bf16 %v349_v47, %v348_v46  ;;  %v1484_v51 = vld [vmem:[#allocation6 + $0x18] sm:$0xff]  ;;  %v1487_v52 = vld [vmem:[#allocation6 + $0x20] sm:$0xff]  ;;  %v1494_v53 = vld [vmem:[#allocation6 + $0x28] sm:$0xff]  ;;  %v1198_v57 = vpack.c.bf16 %v1473_v48, %v1430_v9 }
  0x44   :  { %1081 = vmatprep.subr.bf16.mxu1 %v1435_v15  ;;  %v1497_v54 = vld [vmem:[#allocation6 + $0x30] sm:$0xff]  ;;  %v1503_v55 = vld [vmem:[#allocation6 + $0x38] sm:$0xff]  ;;  %v1196_v56 = vpack.c.bf16 %v1494_v53, %v1487_v52  ;;  %v1202_v62 = vpack.c.bf16 %v1484_v51, %v1476_v49 }
  0x45   :  { %v1200_v60 = vpack.c.bf16 %v1503_v55, %v1497_v54 }
  0x46   :  { %1143 = vmatpush3.bf16.msra.mxu0 %v1448_v25 }
  0x47   :  { %1083 = vmatpush3.bf16.msra.mxu1 %v1435_v15  ;;  %1145 = vmatprep.subr.bf16.mxu0 %v1456_v31 }
  0x48   :  { %1085 = vmatprep.subr.bf16.mxu1 %v1445_v23 }
  0x4a   :  { %1147 = vmatpush3.bf16.msra.mxu0 %v1456_v31 }
  0x4b   :  { %1087 = vmatpush3.bf16.msra.mxu1 %v1445_v23  ;;  %1149 = vmatprep.subr.bf16.mxu0 %v1462_v37 }
  0x4c   :  { %1089 = vmatprep.subr.bf16.mxu1 %v1453_v29 }
  0x4e   :  { %1151 = vmatpush3.bf16.msra.mxu0 %v1462_v37 }
  0x4f   :  { %1091 = vmatpush3.bf16.msra.mxu1 %v1453_v29  ;;  %1153 = vmatprep.subr.bf16.mxu0 %v1467_v42 }
  0x50   :  { %1093 = vmatprep.subr.bf16.mxu1 %v1092_v35 }
  0x52   :  { %1155 = vmatpush3.bf16.msra.mxu0 %v1467_v42 }
  0x53   :  { %1095 = vmatpush3.bf16.msra.mxu1 %v1092_v35  ;;  %1157 = vmatprep.subr.bf16.mxu0 %v1471_v45 }
  0x54   :  { %1097 = vmatprep.subr.bf16.mxu1 %v1096_v41 }
  0x56   :  { %1159 = vmatpush3.bf16.msra.mxu0 %v1471_v45 }
  0x57   :  { %1099 = vmatpush3.bf16.msra.mxu1 %v1096_v41  ;;  %1161 = vmatprep.subr.bf16.mxu0 %v1480_v50 }
  0x58   :  { %1101 = vmatprep.subr.bf16.mxu1 %v1421_v3 }
  0x5a   :  { %925 = vmatmul.mubr.f32.vlgmr.msra.gmra.mrb[0].mxu1 %v1473_v48  ;;  %1163 = vmatpush3.bf16.msra.mxu0 %v1480_v50 }
  0x5b   :  { %927 = vmatprep.mubr.f32.mxu1 %v1476_v49  ;;  %1103 = vmatpush3.bf16.msra.mxu1 %v1421_v3 }
  0x5c   :  { %1105 = vmatprep.subr.bf16.mxu1 %v1423_v5  ;;  %1197 = vmatprep.subr.bf16.mxu0 %v1196_v56 }
  0x5e   :  { %928 = vmatmul.mubr.f32.gmra.mrb[2].mxu1 %v1484_v51 }
  0x5f   :  { %930 = vmatprep.mubr.f32.mxu1 %v1487_v52  ;;  %1107 = vmatpush3.bf16.msra.mxu1 %v1423_v5 }
  0x60   :  { %1109 = vmatprep.subr.bf16.mxu1 %v1428_v8 }
  0x62   :  { %931 = vmatmul.mubr.f32.gmra.mrb[4].mxu1 %v1494_v53 }
  0x63   :  { %933 = vmatprep.mubr.f32.mxu1 %v1497_v54  ;;  %1111 = vmatpush3.bf16.msra.mxu1 %v1428_v8 }
  0x64   :  { %1113 = vmatprep.subr.bf16.mxu1 %v1435_v15 }
  0x66   :  { %934 = vmatmul.mubr.f32.gmra.mrb[6].mxu1 %v1503_v55 }
  0x67   :  { %1115 = vmatpush3.bf16.msra.mxu1 %v1435_v15 }
  0x68   :  { %1117 = vmatprep.subr.bf16.mxu1 %v1445_v23 }
  0x6b   :  { %1119 = vmatpush3.bf16.msra.mxu1 %v1445_v23 }
  0x6c   :  { %1121 = vmatprep.subr.bf16.mxu1 %v1453_v29 }
  0x6f   :  { %1123 = vmatpush3.bf16.msra.mxu1 %v1453_v29 }
  0x70   :  { %1125 = vmatprep.subr.bf16.mxu1 %v1092_v35 }
  0x73   :  { %1127 = vmatpush3.bf16.msra.mxu1 %v1092_v35 }
  0x74   :  { %1129 = vmatprep.subr.bf16.mxu1 %v1096_v41 }
  0x77   :  { %1131 = vmatpush3.bf16.msra.mxu1 %v1096_v41 }
  0x78   :  { %1165 = vmatprep.subr.bf16.mxu1 %v1437_v17 }
 0x12d   :  { %v1518_v58 = vpop.f32.mrb[0].mxu1 }
 0x12e   :  { %v1520_v59 = vpop.f32.mrb[1].mxu1 }
 0x12f   :  { %v1206_v61 = vpack.c.bf16 %v1518_v58, %v1520_v59  ;;  %968 = vmatprep.mubr.f32.mxu1 %v1520_v59  ;;  %1012 = vmatprep.mubr.f32.mxu0 %v1520_v59 }
 0x130   :  { %969 = vmatmul.mubr.f32.vlgmr.msra.gmra.mrb[8].mxu1 %v1518_v58  ;;  %1013 = vmatmul.mubr.f32.vlgmr.msra.gmra.mrb[0].mxu0 %v1518_v58 }
 0x131   :  { %v1532_v63 = vpop.f32.mrb[2].mxu1  ;;  %1199 = vmatpush1.bf16.msra.mxu0 %v1198_v57  ;;  %1167 = vmatpush3.bf16.msra.mxu1 %v1437_v17 }
 0x132   :  { %v1535_v0 = vpop.f32.mrb[3].mxu1  ;;  %1201 = vmatprep.subr.bf16.mxu0 %v1200_v60  ;;  %1169 = vmatprep.subr.bf16.mxu1 %v1439_v20 }
 0x133   :  { %v1210_v1 = vpack.c.bf16 %v1532_v63, %v1535_v0  ;;  %971 = vmatprep.mubr.f32.mxu1 %v1535_v0  ;;  %1015 = vmatprep.mubr.f32.mxu0 %v1535_v0 }
 0x134   :  { %972 = vmatmul.mubr.f32.gmra.mrb[10].mxu1 %v1532_v63  ;;  %1016 = vmatmul.mubr.f32.gmra.mrb[2].mxu0 %v1532_v63 }
 0x135   :  { %v1544_v2 = vpop.f32.mrb[4].mxu1  ;;  %1203 = vmatpush1.bf16.msra.mxu0 %v1202_v62  ;;  %1171 = vmatpush3.bf16.msra.mxu1 %v1439_v20 }
 0x136   :  { %v1547_v3 = vpop.f32.mrb[5].mxu1  ;;  %1173 = vmatprep.subr.bf16.mxu1 %v1448_v25 }
 0x137   :  { %974 = vmatprep.mubr.f32.mxu1 %v1547_v3  ;;  %1018 = vmatprep.mubr.f32.mxu0 %v1547_v3  ;;  %v1204_v4 = vpack.c.bf16 %v1544_v2, %v1547_v3 }
 0x138   :  { %975 = vmatmul.mubr.f32.gmra.mrb[12].mxu1 %v1544_v2  ;;  %1019 = vmatmul.mubr.f32.gmra.mrb[4].mxu0 %v1544_v2 }
 0x139   :  { %v1556_v5 = vpop.f32.mrb[6].mxu1  ;;  %1205 = vmatprep.subr.bf16.mxu0 %v1204_v4  ;;  %1175 = vmatpush3.bf16.msra.mxu1 %v1448_v25 }
 0x13a   :  { %v1559_v6 = vpop.f32.mrb[7].mxu1  ;;  %1207 = vmatpush1.bf16.msra.mxu0 %v1206_v61  ;;  %1177 = vmatprep.subr.bf16.mxu1 %v1456_v31 }
 0x13b   :  { %977 = vmatprep.mubr.f32.mxu1 %v1559_v6  ;;  %1021 = vmatprep.mubr.f32.mxu0 %v1559_v6  ;;  %v1208_v7 = vpack.c.bf16 %v1556_v5, %v1559_v6 }
 0x13c   :  { %978 = vmatmul.mubr.f32.gmra.mrb[14].mxu1 %v1556_v5  ;;  %1022 = vmatmul.mubr.f32.gmra.mrb[6].mxu0 %v1556_v5 }
 0x13d   :  { %1209 = vmatprep.subr.bf16.mxu0 %v1208_v7  ;;  %1179 = vmatpush3.bf16.msra.mxu1 %v1456_v31 }
 0x13e   :  { %1211 = vmatpush1.bf16.msra.mxu0 %v1210_v1  ;;  %1181 = vmatprep.subr.bf16.mxu1 %v1462_v37 }
 0x141   :  { %1183 = vmatpush3.bf16.msra.mxu1 %v1462_v37 }
 0x142   :  { %1185 = vmatprep.subr.bf16.mxu1 %v1467_v42 }
 0x145   :  { %1187 = vmatpush3.bf16.msra.mxu1 %v1467_v42 }
 0x146   :  { %1189 = vmatprep.subr.bf16.mxu1 %v1471_v45 }
 0x149   :  { %1191 = vmatpush3.bf16.msra.mxu1 %v1471_v45 }
 0x14a   :  { %1193 = vmatprep.subr.bf16.mxu1 %v1480_v50 }
 0x14d   :  { %1195 = vmatpush3.bf16.msra.mxu1 %v1480_v50  ;;  %v642_v50 = vld [vmem:[%s1627_s3 + $0x10] sm:$0xff] }
 0x203   :  { %v970_v8 = vpop.f32.mrb[8].mxu1  ;;  %v1014_v10 = vpop.f32.mrb[0].mxu0 }
 0x204   :  { %v310_v11 = vmul.f32 2.0, %v970_v8  ;;  %v270_v12 = vpop.f32.mrb[9].mxu1  ;;  %v416_v13 = vpop.f32.mrb[1].mxu0 }
 0x205   :  { %v309_v14 = vmul.f32 2.0, %v270_v12  ;;  %v1222_v15 = vpack.c.bf16 %v1014_v10, %v416_v13  ;;  %1056 = vmatprep.mubr.f32.mxu1 %v416_v13 }
 0x206   :  { %v318_v16 = vsub.f32 %v310_v11, %v1473_v48  ;;  %1057 = vmatmul.mubr.f32.vlgmr.msra.gmra.mrb[16].mxu1 %v1014_v10  ;;  %v593_v48 = vld [vmem:[#allocation8 + $0x8] sm:$0xff] }
 0x207   :  { %v317_v17 = vsub.f32 %v309_v14, %v1430_v9  ;;  %v973_v18 = vpop.f32.mrb[10].mxu1  ;;  %v1017_v19 = vpop.f32.mrb[2].mxu0  ;;  %792 = vmatprep.mubr.msk.f32.mxu0 %vm664_vm0, %v593_v48 }
 0x208   :  { %v312_v20 = vmul.f32 2.0, %v973_v18  ;;  %v280_v21 = vpop.f32.mrb[11].mxu1  ;;  %v426_v22 = vpop.f32.mrb[3].mxu0 }
 0x209   :  { %v1214_v23 = vpack.c.bf16 %v318_v16, %v317_v17  ;;  %v311_v24 = vmul.f32 2.0, %v280_v21  ;;  %v1226_v25 = vpack.c.bf16 %v1017_v19, %v426_v22  ;;  %1059 = vmatprep.mubr.f32.mxu1 %v426_v22 }
 0x20a   :  { %v320_v26 = vsub.f32 %v312_v20, %v1484_v51  ;;  %1060 = vmatmul.mubr.f32.gmra.mrb[18].mxu1 %v1017_v19  ;;  %v1348_v51 = vmov 0  }
 0x20b   :  { %v319_v27 = vsub.f32 %v311_v24, %v1476_v49  ;;  %v976_v28 = vpop.f32.mrb[12].mxu1  ;;  %v1020_v29 = vpop.f32.mrb[4].mxu0  ;;  %v640_v49 = vld [vmem:[%s1627_s3] sm:$0xff]  ;;  %1245 = vset.pattern.permute.xlu0 %v1348_v51  ;;  %1246 = vset.pattern.permute.xlu1 %v1348_v51  ;;  %v595_v24 = vld [vmem:[#allocation8 + $0x18] sm:$0xff] }
 0x20c   :  { %v314_v30 = vmul.f32 2.0, %v976_v28  ;;  %v290_v31 = vpop.f32.mrb[13].mxu1  ;;  %v436_v32 = vpop.f32.mrb[5].mxu0  ;;  %646 = vperm.xlu0 %1245, %v640_v49   ;;  %656 = vperm.xlu1 %1246, %v642_v50  }
 0x20d   :  { %v1218_v9 = vpack.c.bf16 %v320_v26, %v319_v27  ;;  %v313_v33 = vmul.f32 2.0, %v290_v31  ;;  %v1220_v34 = vpack.c.bf16 %v1020_v29, %v436_v32  ;;  %1062 = vmatprep.mubr.f32.mxu1 %v436_v32  ;;  %v599_v26 = vld [vmem:[#allocation8 + $0x38] sm:$0xff] }
 0x20e   :  { %v322_v35 = vsub.f32 %v314_v30, %v1494_v53  ;;  %1063 = vmatmul.mubr.f32.gmra.mrb[20].mxu1 %v1020_v29  ;;  %v643_v53 = vld [vmem:[%s1627_s3 + $0x18] sm:$0xff] }
 0x20f   :  { %v321_v36 = vsub.f32 %v313_v33, %v1487_v52  ;;  %v979_v37 = vpop.f32.mrb[14].mxu1  ;;  %v1023_v38 = vpop.f32.mrb[6].mxu0  ;;  %v641_v52 = vld [vmem:[%s1627_s3 + $0x8] sm:$0xff]  ;;  %s1349_s3 = smov [#allocation9]  }
 0x210   :  { %v316_v39 = vmul.f32 2.0, %v979_v37  ;;  %v300_v40 = vpop.f32.mrb[15].mxu1  ;;  %v446_v41 = vpop.f32.mrb[7].mxu0  ;;  %651 = vperm.xlu0 %1245, %v641_v52   ;;  %661 = vperm.xlu1 %1246, %v643_v53   ;;  %s779_s8 = sshll.u32 %s1349_s3, 4  ;;  %s780_s8 = int_to_ptr.vmem [resolvable:$true] %s779_s8 }
 0x211   :  { %v315_v42 = vmul.f32 2.0, %v300_v40  ;;  %v1224_v43 = vpack.c.bf16 %v1023_v38, %v446_v41  ;;  %1065 = vmatprep.mubr.f32.mxu1 %v446_v41  ;;  %v1212_v44 = vpack.c.bf16 %v322_v35, %v321_v36  ;;  %s1313_s9 = scalar_lea.vmem %s780_s8, 1024  ;;  %p1318_p11 = scmp.lt.s32.totalorder %s780_s8, %s780_s8 }
 0x212   :  { %v324_v45 = vsub.f32 %v316_v39, %v1503_v55  ;;  %1066 = vmatmul.mubr.f32.gmra.mrb[22].mxu1 %v1023_v38  ;;  %p1314_p10 = scmp.ne.s32.totalorder %s780_s8, %s1313_s9  ;;  %p1319_p12 = scmp.lt.s32.totalorder %s1313_s9, %s1313_s9 }
 0x213   :  { %v323_v46 = vsub.f32 %v315_v42, %v1497_v54  ;;  %1213 = vmatprep.subr.bf16.mxu0 %v1212_v44 }
 0x214   :  { %1215 = vmatpush1.bf16.msra.mxu0 %v1214_v23  ;;  %v592_v23 = vld [vmem:[#allocation8] sm:$0xff]  ;;  %p1320_p13 = por %p1319_p12, %p1318_p11 }
 0x215   :  { %v1216_v47 = vpack.c.bf16 %v324_v45, %v323_v46 }
 0x216   :  { %p1321_p0 = pnand %p1320_p13, %p1314_p10 }
 0x217   :  { %1217 = vmatprep.subr.bf16.mxu0 %v1216_v47 }
 0x218   :  { %1219 = vmatpush1.bf16.msra.mxu0 %v1218_v9 }
 0x219   :  { %1221 = vmatprep.subr.bf16.mxu0 %v1220_v34 }
 0x21c   :  { %1223 = vmatpush1.bf16.msra.mxu0 %v1222_v15 }
 0x21d   :  { %1225 = vmatprep.subr.bf16.mxu0 %v1224_v43 }
 0x220   :  { %1227 = vmatpush1.bf16.msra.mxu0 %v1226_v25  ;;  %v596_v25 = vld [vmem:[#allocation8 + $0x20] sm:$0xff] }
 0x28b   :  { %v657_v34 = vpop.permute.xlu1 %656 }
 0x28f   :  { %v662_v40 = vpop.permute.xlu1 %661 }
 0x2d9   :  { %v1058_v54 = vpop.f32.mrb[16].mxu1 }
 0x2da   :  { %v569_v55 = vmul.f32 2.0, %v1058_v54  ;;  %v529_v56 = vpop.f32.mrb[17].mxu1 }
 0x2db   :  { %v568_v57 = vmul.f32 2.0, %v529_v56 }
 0x2dc   :  { %v577_v60 = vsub.f32 %v569_v55, %v1518_v58 }
 0x2dd   :  { %v576_v61 = vsub.f32 %v568_v57, %v1520_v59  ;;  %v1061_v62 = vpop.f32.mrb[18].mxu1 }
 0x2de   :  { %v571_v1 = vmul.f32 2.0, %v1061_v62  ;;  %v539_v4 = vpop.f32.mrb[19].mxu1 }
 0x2df   :  { %v1230_v7 = vpack.c.bf16 %v577_v60, %v576_v61  ;;  %v570_v8 = vmul.f32 2.0, %v539_v4 }
 0x2e0   :  { %v579_v10 = vsub.f32 %v571_v1, %v1532_v63 }
 0x2e1   :  { %v578_v11 = vsub.f32 %v570_v8, %v1535_v0  ;;  %v1064_v12 = vpop.f32.mrb[20].mxu1 }
 0x2e2   :  { %v573_v13 = vmul.f32 2.0, %v1064_v12  ;;  %v549_v14 = vpop.f32.mrb[21].mxu1 }
 0x2e3   :  { %v1234_v15 = vpack.c.bf16 %v579_v10, %v578_v11  ;;  %v572_v16 = vmul.f32 2.0, %v549_v14 }
 0x2e4   :  { %v581_v17 = vsub.f32 %v573_v13, %v1544_v2  ;;  %v594_v2 = vld [vmem:[#allocation8 + $0x10] sm:$0xff] }
 0x2e5   :  { %v580_v58 = vsub.f32 %v572_v16, %v1547_v3  ;;  %v1067_v18 = vpop.f32.mrb[22].mxu1  ;;  %v597_v3 = vld [vmem:[#allocation8 + $0x28] sm:$0xff] }
 0x2e6   :  { %v575_v59 = vmul.f32 2.0, %v1067_v18  ;;  %v559_v19 = vpop.f32.mrb[23].mxu1 }
 0x2e7   :  { %v574_v20 = vmul.f32 2.0, %v559_v19  ;;  %v1228_v21 = vpack.c.bf16 %v581_v17, %v580_v58 }
 0x2e8   :  { %v583_v22 = vsub.f32 %v575_v59, %v1556_v5  ;;  %v598_v5 = vld [vmem:[#allocation8 + $0x30] sm:$0xff] }
 0x2e9   :  { %v582_v63 = vsub.f32 %v574_v20, %v1559_v6  ;;  %1229 = vmatprep.subr.bf16.mxu0 %v1228_v21  ;;  %v647_v6 = vpop.permute.xlu0 %646 }
 0x2ea   :  { %1231 = vmatpush1.bf16.msra.mxu0 %v1230_v7 }
 0x2eb   :  { %v1232_v0 = vpack.c.bf16 %v583_v22, %v582_v63 }
 0x2ed   :  { %1233 = vmatprep.subr.bf16.mxu0 %v1232_v0  ;;  %v652_v31 = vpop.permute.xlu0 %651 }
 0x2ee   :  { %1235 = vmatpush1.bf16.msra.mxu0 %v1234_v15 }
 0x2f1   :  { %742 = vmatmul.mubr.f32.vlgmr.msra.gmra.mrb[8].mxu0 %v592_v23 }
 0x2f2   :  { %793 = vmatprep.mubr.msk.f32.mxu0 %vm664_vm0, %v595_v24 }
 0x2f5   :  { %748 = vmatmul.mubr.f32.gmra.mrb[10].mxu0 %v594_v2 }
 0x2f6   :  { %794 = vmatprep.mubr.msk.f32.mxu0 %vm664_vm0, %v597_v3 }
 0x2f9   :  { %754 = vmatmul.mubr.f32.gmra.mrb[12].mxu0 %v596_v25 }
 0x2fa   :  { %795 = vmatprep.mubr.msk.f32.mxu0 %vm664_vm0, %v599_v26 }
 0x2fd   :  { %760 = vmatmul.mubr.f32.gmra.mrb[14].mxu0 %v598_v5 }
 0x3c4   :  { %v743_v27 = vpop.f32.mrb[8].mxu0 }
 0x3c5   :  { %v744_v28 = vadd.f32 %v743_v27, %v647_v6  ;;  %v745_v29 = vpop.f32.mrb[9].mxu0 }
 0x3c6   :  { %v746_v30 = vadd.f32 %v745_v29, %v647_v6 }
 0x3c7   :  { %766 = vst [vmem:[#allocation9] sm:$0xff] %v744_v28 }
 0x3c8   :  { %767 = vst [vmem:[#allocation9 + $0x8] sm:$0xff] %v746_v30  ;;  %v749_v32 = vpop.f32.mrb[10].mxu0 }
 0x3c9   :  { %v750_v9 = vadd.f32 %v749_v32, %v652_v31  ;;  %v751_v33 = vpop.f32.mrb[11].mxu0 }
 0x3ca   :  { %v752_v35 = vadd.f32 %v751_v33, %v652_v31 }
 0x3cb   :  { %768 = vst [vmem:[#allocation9 + $0x10] sm:$0xff] %v750_v9 }
 0x3cc   :  { %769 = vst [vmem:[#allocation9 + $0x18] sm:$0xff] %v752_v35  ;;  %v755_v36 = vpop.f32.mrb[12].mxu0 }
 0x3cd   :  { %v756_v37 = vadd.f32 %v755_v36, %v657_v34  ;;  %v757_v38 = vpop.f32.mrb[13].mxu0 }
 0x3ce   :  { %v758_v39 = vadd.f32 %v757_v38, %v657_v34 }
 0x3cf   :  { %770 = vst [vmem:[#allocation9 + $0x20] sm:$0xff] %v756_v37 }
 0x3d0   :  { %771 = vst [vmem:[#allocation9 + $0x28] sm:$0xff] %v758_v39  ;;  %v761_v41 = vpop.f32.mrb[14].mxu0 }
 0x3d1   :  { %v762_v42 = vadd.f32 %v761_v41, %v662_v40  ;;  %v763_v43 = vpop.f32.mrb[15].mxu0 }
 0x3d2   :  { %v764_v44 = vadd.f32 %v763_v43, %v662_v40 }
 0x3d3   :  { %772 = vst [vmem:[#allocation9 + $0x30] sm:$0xff] %v762_v42 }
 0x3d4   :  { %773 = vst [vmem:[#allocation9 + $0x38] sm:$0xff] %v764_v44 }
 0x3d5   :  { %1324 = shalt.err (!%p1321_p0)
}
 0x3d6   :  { %s1325_s12 = scalar_lea.hbm %s1628_s4, 1024 }
 0x3d7   :  { %p1326_p1 = scmp.ne.s32.totalorder %s1628_s4, %s1325_s12  ;;  %p1329_p2 = scmp.lt.u32.totalorder %s1325_s12, %s1628_s4 }
 0x3d9   :  { %p1331_p3 = pnand %p1329_p2, %p1326_p1 }
 0x3db   :  { %1334 = shalt.err (!%p1331_p3)
}
 0x3dc   :  { %785 = dma.vmem_to_hbm [thread:$0]  %s780_s8, 1024, %s1628_s4, [#allocation5], %s1346_s0, %s1346_s0, %s1347_s18  }
 0x3dd   :  { %1339 = dma.done.wait [#allocation5], 1024  }
 0x3de   :  { %1340 = vsyncadd [#allocation5], 4294966272 }
 0x3df   :  { %789 = vsyncpa [#allocation4], 1 }
 0x3e0   :  { %790 = vsyncpa [#allocation7], 1 }
 0x3e1   :  { %791 = vsyncpa [#allocation5], 1 }

</bundles_post_ra>
